<compile_context>
chip_gen: v6e
topology: v6e:2x2x1
jax: 0.10.0
libtpu: 0.0.40
codegen_flags: <defaults>
</compile_context>

<pallas_src>
import jax
import jax.numpy as jnp
from jax import lax
from jax.experimental import pallas as pl
from jax.experimental.pallas import tpu as pltpu


# ----------------------------- Pallas kernel --------------------------------
def regnn_kernel(a1_ref, x1_ref, a2_ref, x2_ref,
                 w1_ref, b1_ref, w2_ref, b2_ref, w3_ref, b3_ref,
                 wm1_ref, wm2_ref,
                 mean1_ref, mean2_ref, exp1_ref, exp2_ref,
                 out_ref):
    w1, b1 = w1_ref[...], b1_ref[...]
    w2, b2 = w2_ref[...], b2_ref[...]
    w3, b3 = w3_ref[...], b3_ref[...]

    def gcn_pass(a, x):
        # GCNConv on B stacked graphs: blockdiag(Ahat) @ (X @ W) + b ; relu after 1,2.
        # TODO(synk): dropout (p=args.dropout) is identity in inference mode.
        # TODO(synk): for large graphs (N >~ 256) cast a/x/h and weights to bf16 here
        # (keep preferred_element_type=f32 and f32 elementwise) for MXU speed on v6e/v7x,
        # and tile the A@H contraction over N (v7x has only 64 MiB VMEM).
        h = jnp.dot(a, jnp.dot(x, w1, preferred_element_type=jnp.float32),
                    preferred_element_type=jnp.float32) + b1
        h = jnp.maximum(h, 0.0)
        h = jnp.dot(a, jnp.dot(h, w2, preferred_element_type=jnp.float32),
                    preferred_element_type=jnp.float32) + b2
        h = jnp.maximum(h, 0.0)
        h = jnp.dot(a, jnp.dot(h, w3, preferred_element_type=jnp.float32),
                    preferred_element_type=jnp.float32) + b3
        return h

    f1 = gcn_pass(a1_ref[...], x1_ref[...])   # (B*N1, F3)
    f2 = gcn_pass(a2_ref[...], x2_ref[...])   # (B*N2, F3)

    # MatchingModule per pair: tanh(mean(F @ Wm, 0)) == tanh(mean(F, 0) @ Wm).
    # Per-pair means via a constant (B, B*N) averaging matmul (MXU, no reshapes).
    mu1 = jnp.dot(mean1_ref[...], f1, preferred_element_type=jnp.float32)   # (B, F3)
    mu2 = jnp.dot(mean2_ref[...], f2, preferred_element_type=jnp.float32)   # (B, F3)
    m1 = jnp.tanh(jnp.dot(mu1, wm1_ref[...], preferred_element_type=jnp.float32))
    m2 = jnp.tanh(jnp.dot(mu2, wm2_ref[...], preferred_element_type=jnp.float32))

    # Broadcast each pair's matching vector back onto its own rows (constant expand
    # matrix matmul), then subtract.
    af1 = f1 - jnp.dot(exp1_ref[...], m2, preferred_element_type=jnp.float32)  # (B*N1, F3)
    af2 = f2 - jnp.dot(exp2_ref[...], m1, preferred_element_type=jnp.float32)  # (B*N2, F3)

    # One full-width lane-dense NT matmul (no materialized transpose, no zero pad).
    # Off-diagonal (cross-pair) blocks are junk and are dropped by the wrapper.
    scores = lax.dot_general(af1, af2, (((1,), (1,)), ((), ())),
                             preferred_element_type=jnp.float32)
    out_ref[...] = jax.nn.sigmoid(scores)   # (B*N1, B*N2) unmasked slab store


# ------------------------------- Wrapper -------------------------------------
def regnn_forward(ahat1, x1, ahat2, x2, params, *, pairs_per_block=16):
    """ahat1/ahat2: (P, N, N) normalized adjacencies; x1/x2: (P, N, L) features.

    pairs_per_block=16 gives 128 stacked rows (fills the v5e 128-wide MXU exactly);
    32 (256 rows) can be used on v6e/v7x.
    """
    p, n1, _ = ahat1.shape
    n2 = ahat2.shape[1]
    num_labels = x1.shape[2]
    f1 = params["w1"].shape[1]
    f2 = params["w2"].shape[1]
    f3 = params["w3"].shape[1]

    bsz = pairs_per_block
    pad = (-p) % bsz
    if pad:
        # Pad with empty graphs; padded pairs are sliced off at the end.
        ahat1 = jnp.concatenate([ahat1, jnp.zeros((pad, n1, n1), ahat1.dtype)], 0)
        ahat2 = jnp.concatenate([ahat2, jnp.zeros((pad, n2, n2), ahat2.dtype)], 0)
        x1 = jnp.concatenate([x1, jnp.zeros((pad, n1, num_labels), x1.dtype)], 0)
        x2 = jnp.concatenate([x2, jnp.zeros((pad, n2, num_labels), x2.dtype)], 0)
    pb = (p + pad) // bsz           # grid extent (keep even for v7x core balance)
    r1, r2 = bsz * n1, bsz * n2     # stacked row counts per block

    # --- layout glue (plain JAX, outside the kernel) -------------------------
    def block_diag(a, n):
        # (pb*bsz, n, n) -> (pb, bsz*n, bsz*n) block-diagonal.
        blocks = a.reshape(pb, bsz, n, n)
        eye = jnp.eye(bsz, dtype=a.dtype)
        return jnp.einsum("pbij,bc->pbicj", blocks, eye).reshape(pb, bsz * n, bsz * n)

    a1b = block_diag(ahat1, n1)                     # (pb, r1, r1)
    a2b = block_diag(ahat2, n2)                     # (pb, r2, r2)
    x1b = x1.reshape(pb, r1, num_labels)
    x2b = x2.reshape(pb, r2, num_labels)

    eye = jnp.eye(bsz, dtype=jnp.float32)
    mean1 = jnp.kron(eye, jnp.full((1, n1), 1.0 / n1, jnp.float32))   # (bsz, r1)
    mean2 = jnp.kron(eye, jnp.full((1, n2), 1.0 / n2, jnp.float32))   # (bsz, r2)
    exp1 = jnp.kron(eye, jnp.ones((n1, 1), jnp.float32))              # (r1, bsz)
    exp2 = jnp.kron(eye, jnp.ones((n2, 1), jnp.float32))              # (r2, bsz)

    # --- cost estimate (advisory) --------------------------------------------
    def mm(m, k, n):
        return 2 * m * k * n
    flops_block = (
        mm(r1, num_labels, f1) + mm(r1, r1, f1)
        + mm(r1, f1, f2) + mm(r1, r1, f2)
        + mm(r1, f2, f3) + mm(r1, r1, f3)
        + mm(r2, num_labels, f1) + mm(r2, r2, f1)
        + mm(r2, f1, f2) + mm(r2, r2, f2)
        + mm(r2, f2, f3) + mm(r2, r2, f3)
        + mm(bsz, r1, f3) + mm(bsz, r2, f3)
        + 2 * mm(bsz, f3, f3)
        + mm(r1, bsz, f3) + mm(r2, bsz, f3)
        + mm(r1, f3, r2)
    )
    weights_bytes = 4 * (num_labels * f1 + f1 + f1 * f2 + f2 + f2 * f3 + f3
                         + 2 * f3 * f3 + bsz * (r1 + r2) + (r1 + r2) * bsz)
    cost = pl.CostEstimate(
        flops=pb * flops_block,
        transcendentals=pb * (2 * bsz * f3 + r1 * r2),
        bytes_accessed=4 * (a1b.size + x1b.size + a2b.size + x2b.size + pb * r1 * r2)
        + weights_bytes,
    )

    # --- pallas_call ----------------------------------------------------------
    def blk_spec(n, c):
        # Per-block slab; leading block-index dim squeezed out of the kernel view.
        return pl.BlockSpec((None, n, c), lambda i: (i, 0, 0))

    def const_spec(shape):
        # Shared constants: constant index_map -> DMA'd once, VMEM-resident across grid.
        return pl.BlockSpec(shape, lambda i: (0, 0))

    out_blocks = pl.pallas_call(
        regnn_kernel,
        out_shape=jax.ShapeDtypeStruct((pb, r1, r2), jnp.float32),
        grid=(pb,),
        in_specs=[
            blk_spec(r1, r1), blk_spec(r1, num_labels),
            blk_spec(r2, r2), blk_spec(r2, num_labels),
            const_spec((num_labels, f1)), const_spec((1, f1)),
            const_spec((f1, f2)),         const_spec((1, f2)),
            const_spec((f2, f3)),         const_spec((1, f3)),
            const_spec((f3, f3)),         const_spec((f3, f3)),
            const_spec((bsz, r1)), const_spec((bsz, r2)),
            const_spec((r1, bsz)), const_spec((r2, bsz)),
        ],
        out_specs=pl.BlockSpec((None, r1, r2), lambda i: (i, 0, 0)),
        compiler_params=pltpu.CompilerParams(
            dimension_semantics=("parallel",)),   # block axis shards across v7x's 2 TCs
        cost_estimate=cost,
    )(a1b, x1b, a2b, x2b,
      params["w1"], params["b1"], params["w2"], params["b2"],
      params["w3"], params["b3"], params["wm1"], params["wm2"],
      mean1, mean2, exp1, exp2)

    # Gather the per-pair diagonal (N1, N2) blocks out of each (B*N1, B*N2) tile.
    blocks5 = out_blocks.reshape(pb, bsz, n1, bsz, n2)
    bidx = jnp.arange(bsz)
    diag = blocks5[:, bidx, :, bidx, :]                    # (bsz, pb, n1, n2)
    scores = jnp.transpose(diag, (1, 0, 2, 3)).reshape(pb * bsz, n1, n2)
    return scores[:p]


# ---------------------------- Glue / setup ------------------------------------
def normalized_adjacency(edge_index, num_nodes):
    """Dense GCN normalization: D^-1/2 (A + I) D^-1/2 (plain-JAX scatter glue)."""
    src, dst = edge_index
    a = jnp.zeros((num_nodes, num_nodes), jnp.float32)
    a = a.at[src, dst].set(1.0)
    a = a + jnp.eye(num_nodes, dtype=jnp.float32)          # self loops
    deg = jnp.sum(a, axis=1)
    dinv = jnp.where(deg > 0, 1.0 / jnp.sqrt(deg), 0.0)
    return a * dinv[:, None] * dinv[None, :]


def glorot(key, fan_in, fan_out):
    limit = jnp.sqrt(6.0 / (fan_in + fan_out))
    return jax.random.uniform(key, (fan_in, fan_out), jnp.float32, -limit, limit)


def make_params(key, number_of_labels, f1, f2, f3):
    ks = jax.random.split(key, 5)
    return {
        "w1": glorot(ks[0], number_of_labels, f1), "b1": jnp.zeros((1, f1), jnp.float32),
        "w2": glorot(ks[1], f1, f2),               "b2": jnp.zeros((1, f2), jnp.float32),
        "w3": glorot(ks[2], f2, f3),               "b3": jnp.zeros((1, f3), jnp.float32),
        "wm1": glorot(ks[3], f3, f3),
        "wm2": glorot(ks[4], f3, f3),
    }


if __name__ == "__main__":
    key = jax.random.PRNGKey(0)
    k_feat1, k_feat2, k_params = jax.random.split(key, 3)

    # Small sizes consistent with the module: a batch of graph pairs.
    P = 32                      # graph pairs; 16 per grid step -> grid=(2,) (even, v7x-friendly)
    N1, N2 = 8, 8
    NUM_LABELS = 16
    F1, F2, F3 = 32, 16, 8

    features_1 = jax.random.uniform(k_feat1, (P, N1, NUM_LABELS), jnp.float32)
    features_2 = jax.random.uniform(k_feat2, (P, N2, NUM_LABELS), jnp.float32)

    def ring_edges(n, skip):
        idx = jnp.arange(n)
        return jnp.stack([jnp.concatenate([idx, (idx + skip) % n]),
                          jnp.concatenate([(idx + skip) % n, idx])])

    # Deterministic, per-pair distinct bidirectional ring graphs.
    ahat1 = jnp.stack([normalized_adjacency(ring_edges(N1, 1 + (pair % 3)), N1)
                       for pair in range(P)])
    ahat2 = jnp.stack([normalized_adjacency(ring_edges(N2, 1 + ((pair + 1) % 3)), N2)
                       for pair in range(P)])

    params = make_params(k_params, NUM_LABELS, F1, F2, F3)

    scores = regnn_forward(ahat1, features_1, ahat2, features_2, params,
                           pairs_per_block=16)
    scores = jax.block_until_ready(scores)

    # Pure-JAX reference (original op order: mean AFTER the Wm matmul, explicit .T).
    def forward_ref(a1, x1, a2, x2, prm):
        def gcn(a, x):
            h = jnp.maximum(a @ (x @ prm["w1"]) + prm["b1"], 0.0)
            h = jnp.maximum(a @ (h @ prm["w2"]) + prm["b2"], 0.0)
            return a @ (h @ prm["w3"]) + prm["b3"]
        g1 = gcn(a1, x1)
        g2 = gcn(a2, x2)
        m1 = jnp.tanh(jnp.mean(g1 @ prm["wm1"], axis=0, keepdims=True))
        m2 = jnp.tanh(jnp.mean(g2 @ prm["wm2"], axis=0, keepdims=True))
        return jax.nn.sigmoid((g1 - m2) @ (g2 - m1).T)

    ref = jax.vmap(lambda a1, x1, a2, x2: forward_ref(a1, x1, a2, x2, params))(
        ahat1, features_1, ahat2, features_2)

    assert scores.shape == (P, N1, N2)
    assert jnp.allclose(scores, ref, atol=1e-4, rtol=1e-4)
    print("KERNEL_OK")
</pallas_src>

<mosaic_0001>
module attributes {stable_mosaic.version = 11 : i64} {
  func.func @regnn_kernel(%arg0: i32, %arg1: memref<1x128x128xf32, #tpu.memory_space<vmem>>, %arg2: memref<1x128x16xf32, #tpu.memory_space<vmem>>, %arg3: memref<1x128x128xf32, #tpu.memory_space<vmem>>, %arg4: memref<1x128x16xf32, #tpu.memory_space<vmem>>, %arg5: memref<16x32xf32, #tpu.memory_space<vmem>>, %arg6: memref<1x32xf32, #tpu.memory_space<vmem>>, %arg7: memref<32x16xf32, #tpu.memory_space<vmem>>, %arg8: memref<1x16xf32, #tpu.memory_space<vmem>>, %arg9: memref<16x8xf32, #tpu.memory_space<vmem>>, %arg10: memref<1x8xf32, #tpu.memory_space<vmem>>, %arg11: memref<8x8xf32, #tpu.memory_space<vmem>>, %arg12: memref<8x8xf32, #tpu.memory_space<vmem>>, %arg13: memref<16x128xf32, #tpu.memory_space<vmem>>, %arg14: memref<16x128xf32, #tpu.memory_space<vmem>>, %arg15: memref<128x16xf32, #tpu.memory_space<vmem>>, %arg16: memref<128x16xf32, #tpu.memory_space<vmem>>, %arg17: memref<1x128x128xf32, #tpu.memory_space<vmem>>) attributes {dimension_semantics = [#tpu.dimension_semantics<parallel>], iteration_bounds = array<i64: 2>, scalar_prefetch = 0 : i64, scratch_operands = 0 : i64, tpu.core_type = #tpu.core_type<tc>, window_params = [{transform_indices = @transform_0, window_bounds = array<i64: 1, 128, 128>}, {transform_indices = @transform_1, window_bounds = array<i64: 1, 128, 16>}, {transform_indices = @transform_2, window_bounds = array<i64: 1, 128, 128>}, {transform_indices = @transform_3, window_bounds = array<i64: 1, 128, 16>}, {pipeline_mode = #tpu.pipeline_mode<synchronous>, transform_indices = @transform_4, window_bounds = array<i64: 16, 32>}, {pipeline_mode = #tpu.pipeline_mode<synchronous>, transform_indices = @transform_5, window_bounds = array<i64: 1, 32>}, {pipeline_mode = #tpu.pipeline_mode<synchronous>, transform_indices = @transform_6, window_bounds = array<i64: 32, 16>}, {pipeline_mode = #tpu.pipeline_mode<synchronous>, transform_indices = @transform_7, window_bounds = array<i64: 1, 16>}, {pipeline_mode = #tpu.pipeline_mode<synchronous>, transform_indices = @transform_8, window_bounds = array<i64: 16, 8>}, {pipeline_mode = #tpu.pipeline_mode<synchronous>, transform_indices = @transform_9, window_bounds = array<i64: 1, 8>}, {pipeline_mode = #tpu.pipeline_mode<synchronous>, transform_indices = @transform_10, window_bounds = array<i64: 8, 8>}, {pipeline_mode = #tpu.pipeline_mode<synchronous>, transform_indices = @transform_11, window_bounds = array<i64: 8, 8>}, {pipeline_mode = #tpu.pipeline_mode<synchronous>, transform_indices = @transform_12, window_bounds = array<i64: 16, 128>}, {pipeline_mode = #tpu.pipeline_mode<synchronous>, transform_indices = @transform_13, window_bounds = array<i64: 16, 128>}, {pipeline_mode = #tpu.pipeline_mode<synchronous>, transform_indices = @transform_14, window_bounds = array<i64: 128, 16>}, {pipeline_mode = #tpu.pipeline_mode<synchronous>, transform_indices = @transform_15, window_bounds = array<i64: 128, 16>}, {transform_indices = @transform_16, window_bounds = array<i64: 1, 128, 128>}]} {
    %c0 = arith.constant 0 : index
    %c0_0 = arith.constant 0 : index
    %0 = vector.load %arg5[%c0, %c0_0] : memref<16x32xf32, #tpu.memory_space<vmem>>, vector<16x32xf32>
    %c0_1 = arith.constant 0 : index
    %c0_2 = arith.constant 0 : index
    %1 = vector.load %arg6[%c0_1, %c0_2] : memref<1x32xf32, #tpu.memory_space<vmem>>, vector<1x32xf32>
    %c0_3 = arith.constant 0 : index
    %c0_4 = arith.constant 0 : index
    %2 = vector.load %arg7[%c0_3, %c0_4] : memref<32x16xf32, #tpu.memory_space<vmem>>, vector<32x16xf32>
    %c0_5 = arith.constant 0 : index
    %c0_6 = arith.constant 0 : index
    %3 = vector.load %arg8[%c0_5, %c0_6] : memref<1x16xf32, #tpu.memory_space<vmem>>, vector<1x16xf32>
    %c0_7 = arith.constant 0 : index
    %c0_8 = arith.constant 0 : index
    %4 = vector.load %arg9[%c0_7, %c0_8] : memref<16x8xf32, #tpu.memory_space<vmem>>, vector<16x8xf32>
    %c0_9 = arith.constant 0 : index
    %c0_10 = arith.constant 0 : index
    %5 = vector.load %arg10[%c0_9, %c0_10] : memref<1x8xf32, #tpu.memory_space<vmem>>, vector<1x8xf32>
    %c0_11 = arith.constant 0 : index
    %c0_12 = arith.constant 0 : index
    %c0_13 = arith.constant 0 : index
    %6 = vector.load %arg1[%c0_11, %c0_12, %c0_13] : memref<1x128x128xf32, #tpu.memory_space<vmem>>, vector<1x128x128xf32>
    %7 = vector.shape_cast %6 : vector<1x128x128xf32> to vector<128x128xf32>
    %c0_14 = arith.constant 0 : index
    %c0_15 = arith.constant 0 : index
    %c0_16 = arith.constant 0 : index
    %8 = vector.load %arg2[%c0_14, %c0_15, %c0_16] : memref<1x128x16xf32, #tpu.memory_space<vmem>>, vector<1x128x16xf32>
    %9 = vector.shape_cast %8 : vector<1x128x16xf32> to vector<128x16xf32>
    %cst = arith.constant dense<0.000000e+00> : vector<128x32xf32>
    %10 = tpu.matmul %9, %0, %cst {dimension_numbers = #tpu.dot_dimension_numbers<[1], [0], [0], [1], [0, 0, 1, 1], [], []>} : vector<128x16xf32>, vector<16x32xf32>, vector<128x32xf32> -> vector<128x32xf32>
    %cst_17 = arith.constant dense<0.000000e+00> : vector<128x32xf32>
    %11 = tpu.matmul %7, %10, %cst_17 {dimension_numbers = #tpu.dot_dimension_numbers<[1], [0], [0], [1], [0, 0, 1, 1], [], []>} : vector<128x128xf32>, vector<128x32xf32>, vector<128x32xf32> -> vector<128x32xf32>
    %12 = vector.broadcast %1 : vector<1x32xf32> to vector<128x32xf32>
    %13 = arith.addf %11, %12 : vector<128x32xf32>
    %cst_18 = arith.constant 0.000000e+00 : f32
    %14 = vector.broadcast %cst_18 : f32 to vector<128x32xf32>
    %15 = arith.maximumf %13, %14 : vector<128x32xf32>
    %cst_19 = arith.constant dense<0.000000e+00> : vector<128x16xf32>
    %16 = tpu.matmul %15, %2, %cst_19 {dimension_numbers = #tpu.dot_dimension_numbers<[1], [0], [0], [1], [0, 0, 1, 1], [], []>} : vector<128x32xf32>, vector<32x16xf32>, vector<128x16xf32> -> vector<128x16xf32>
    %cst_20 = arith.constant dense<0.000000e+00> : vector<128x16xf32>
    %17 = tpu.matmul %7, %16, %cst_20 {dimension_numbers = #tpu.dot_dimension_numbers<[1], [0], [0], [1], [0, 0, 1, 1], [], []>} : vector<128x128xf32>, vector<128x16xf32>, vector<128x16xf32> -> vector<128x16xf32>
    %18 = vector.broadcast %3 : vector<1x16xf32> to vector<128x16xf32>
    %19 = arith.addf %17, %18 : vector<128x16xf32>
    %cst_21 = arith.constant 0.000000e+00 : f32
    %20 = vector.broadcast %cst_21 : f32 to vector<128x16xf32>
    %21 = arith.maximumf %19, %20 : vector<128x16xf32>
    %cst_22 = arith.constant dense<0.000000e+00> : vector<128x8xf32>
    %22 = tpu.matmul %21, %4, %cst_22 {dimension_numbers = #tpu.dot_dimension_numbers<[1], [0], [0], [1], [0, 0, 1, 1], [], []>} : vector<128x16xf32>, vector<16x8xf32>, vector<128x8xf32> -> vector<128x8xf32>
    %cst_23 = arith.constant dense<0.000000e+00> : vector<128x8xf32>
    %23 = tpu.matmul %7, %22, %cst_23 {dimension_numbers = #tpu.dot_dimension_numbers<[1], [0], [0], [1], [0, 0, 1, 1], [], []>} : vector<128x128xf32>, vector<128x8xf32>, vector<128x8xf32> -> vector<128x8xf32>
    %24 = vector.broadcast %5 : vector<1x8xf32> to vector<128x8xf32>
    %25 = arith.addf %23, %24 : vector<128x8xf32>
    %c0_24 = arith.constant 0 : index
    %c0_25 = arith.constant 0 : index
    %c0_26 = arith.constant 0 : index
    %26 = vector.load %arg3[%c0_24, %c0_25, %c0_26] : memref<1x128x128xf32, #tpu.memory_space<vmem>>, vector<1x128x128xf32>
    %27 = vector.shape_cast %26 : vector<1x128x128xf32> to vector<128x128xf32>
    %c0_27 = arith.constant 0 : index
    %c0_28 = arith.constant 0 : index
    %c0_29 = arith.constant 0 : index
    %28 = vector.load %arg4[%c0_27, %c0_28, %c0_29] : memref<1x128x16xf32, #tpu.memory_space<vmem>>, vector<1x128x16xf32>
    %29 = vector.shape_cast %28 : vector<1x128x16xf32> to vector<128x16xf32>
    %cst_30 = arith.constant dense<0.000000e+00> : vector<128x32xf32>
    %30 = tpu.matmul %29, %0, %cst_30 {dimension_numbers = #tpu.dot_dimension_numbers<[1], [0], [0], [1], [0, 0, 1, 1], [], []>} : vector<128x16xf32>, vector<16x32xf32>, vector<128x32xf32> -> vector<128x32xf32>
    %cst_31 = arith.constant dense<0.000000e+00> : vector<128x32xf32>
    %31 = tpu.matmul %27, %30, %cst_31 {dimension_numbers = #tpu.dot_dimension_numbers<[1], [0], [0], [1], [0, 0, 1, 1], [], []>} : vector<128x128xf32>, vector<128x32xf32>, vector<128x32xf32> -> vector<128x32xf32>
    %32 = vector.broadcast %1 : vector<1x32xf32> to vector<128x32xf32>
    %33 = arith.addf %31, %32 : vector<128x32xf32>
    %cst_32 = arith.constant 0.000000e+00 : f32
    %34 = vector.broadcast %cst_32 : f32 to vector<128x32xf32>
    %35 = arith.maximumf %33, %34 : vector<128x32xf32>
    %cst_33 = arith.constant dense<0.000000e+00> : vector<128x16xf32>
    %36 = tpu.matmul %35, %2, %cst_33 {dimension_numbers = #tpu.dot_dimension_numbers<[1], [0], [0], [1], [0, 0, 1, 1], [], []>} : vector<128x32xf32>, vector<32x16xf32>, vector<128x16xf32> -> vector<128x16xf32>
    %cst_34 = arith.constant dense<0.000000e+00> : vector<128x16xf32>
    %37 = tpu.matmul %27, %36, %cst_34 {dimension_numbers = #tpu.dot_dimension_numbers<[1], [0], [0], [1], [0, 0, 1, 1], [], []>} : vector<128x128xf32>, vector<128x16xf32>, vector<128x16xf32> -> vector<128x16xf32>
    %38 = vector.broadcast %3 : vector<1x16xf32> to vector<128x16xf32>
    %39 = arith.addf %37, %38 : vector<128x16xf32>
    %cst_35 = arith.constant 0.000000e+00 : f32
    %40 = vector.broadcast %cst_35 : f32 to vector<128x16xf32>
    %41 = arith.maximumf %39, %40 : vector<128x16xf32>
    %cst_36 = arith.constant dense<0.000000e+00> : vector<128x8xf32>
    %42 = tpu.matmul %41, %4, %cst_36 {dimension_numbers = #tpu.dot_dimension_numbers<[1], [0], [0], [1], [0, 0, 1, 1], [], []>} : vector<128x16xf32>, vector<16x8xf32>, vector<128x8xf32> -> vector<128x8xf32>
    %cst_37 = arith.constant dense<0.000000e+00> : vector<128x8xf32>
    %43 = tpu.matmul %27, %42, %cst_37 {dimension_numbers = #tpu.dot_dimension_numbers<[1], [0], [0], [1], [0, 0, 1, 1], [], []>} : vector<128x128xf32>, vector<128x8xf32>, vector<128x8xf32> -> vector<128x8xf32>
    %44 = vector.broadcast %5 : vector<1x8xf32> to vector<128x8xf32>
    %45 = arith.addf %43, %44 : vector<128x8xf32>
    %c0_38 = arith.constant 0 : index
    %c0_39 = arith.constant 0 : index
    %46 = vector.load %arg13[%c0_38, %c0_39] : memref<16x128xf32, #tpu.memory_space<vmem>>, vector<16x128xf32>
    %cst_40 = arith.constant dense<0.000000e+00> : vector<16x8xf32>
    %47 = tpu.matmul %46, %25, %cst_40 {dimension_numbers = #tpu.dot_dimension_numbers<[1], [0], [0], [1], [0, 0, 1, 1], [], []>} : vector<16x128xf32>, vector<128x8xf32>, vector<16x8xf32> -> vector<16x8xf32>
    %c0_41 = arith.constant 0 : index
    %c0_42 = arith.constant 0 : index
    %48 = vector.load %arg14[%c0_41, %c0_42] : memref<16x128xf32, #tpu.memory_space<vmem>>, vector<16x128xf32>
    %cst_43 = arith.constant dense<0.000000e+00> : vector<16x8xf32>
    %49 = tpu.matmul %48, %45, %cst_43 {dimension_numbers = #tpu.dot_dimension_numbers<[1], [0], [0], [1], [0, 0, 1, 1], [], []>} : vector<16x128xf32>, vector<128x8xf32>, vector<16x8xf32> -> vector<16x8xf32>
    %c0_44 = arith.constant 0 : index
    %c0_45 = arith.constant 0 : index
    %50 = vector.load %arg11[%c0_44, %c0_45] : memref<8x8xf32, #tpu.memory_space<vmem>>, vector<8x8xf32>
    %cst_46 = arith.constant dense<0.000000e+00> : vector<16x8xf32>
    %51 = tpu.matmul %47, %50, %cst_46 {dimension_numbers = #tpu.dot_dimension_numbers<[1], [0], [0], [1], [0, 0, 1, 1], [], []>} : vector<16x8xf32>, vector<8x8xf32>, vector<16x8xf32> -> vector<16x8xf32>
    %52 = math.tanh %51 : vector<16x8xf32>
    %c0_47 = arith.constant 0 : index
    %c0_48 = arith.constant 0 : index
    %53 = vector.load %arg12[%c0_47, %c0_48] : memref<8x8xf32, #tpu.memory_space<vmem>>, vector<8x8xf32>
    %cst_49 = arith.constant dense<0.000000e+00> : vector<16x8xf32>
    %54 = tpu.matmul %49, %53, %cst_49 {dimension_numbers = #tpu.dot_dimension_numbers<[1], [0], [0], [1], [0, 0, 1, 1], [], []>} : vector<16x8xf32>, vector<8x8xf32>, vector<16x8xf32> -> vector<16x8xf32>
    %55 = math.tanh %54 : vector<16x8xf32>
    %c0_50 = arith.constant 0 : index
    %c0_51 = arith.constant 0 : index
    %56 = vector.load %arg15[%c0_50, %c0_51] : memref<128x16xf32, #tpu.memory_space<vmem>>, vector<128x16xf32>
    %cst_52 = arith.constant dense<0.000000e+00> : vector<128x8xf32>
    %57 = tpu.matmul %56, %55, %cst_52 {dimension_numbers = #tpu.dot_dimension_numbers<[1], [0], [0], [1], [0, 0, 1, 1], [], []>} : vector<128x16xf32>, vector<16x8xf32>, vector<128x8xf32> -> vector<128x8xf32>
    %58 = arith.subf %25, %57 : vector<128x8xf32>
    %c0_53 = arith.constant 0 : index
    %c0_54 = arith.constant 0 : index
    %59 = vector.load %arg16[%c0_53, %c0_54] : memref<128x16xf32, #tpu.memory_space<vmem>>, vector<128x16xf32>
    %cst_55 = arith.constant dense<0.000000e+00> : vector<128x8xf32>
    %60 = tpu.matmul %59, %52, %cst_55 {dimension_numbers = #tpu.dot_dimension_numbers<[1], [0], [0], [1], [0, 0, 1, 1], [], []>} : vector<128x16xf32>, vector<16x8xf32>, vector<128x8xf32> -> vector<128x8xf32>
    %61 = arith.subf %45, %60 : vector<128x8xf32>
    %cst_56 = arith.constant dense<0.000000e+00> : vector<128x128xf32>
    %62 = tpu.matmul %58, %61, %cst_56 {dimension_numbers = #tpu.dot_dimension_numbers<[1], [1], [0], [0], [0, 0, 1, 0], [], []>} : vector<128x8xf32>, vector<128x8xf32>, vector<128x128xf32> -> vector<128x128xf32>
    %63 = arith.negf %62 : vector<128x128xf32>
    %64 = math.exp %63 : vector<128x128xf32>
    %cst_57 = arith.constant 1.000000e+00 : f32
    %65 = vector.broadcast %cst_57 : f32 to vector<128x128xf32>
    %66 = arith.addf %65, %64 : vector<128x128xf32>
    %67 = arith.divf %65, %66 : vector<128x128xf32>
    %c0_58 = arith.constant 0 : index
    %c0_59 = arith.constant 0 : index
    %c0_60 = arith.constant 0 : index
    %68 = vector.load %arg17[%c0_58, %c0_59, %c0_60] : memref<1x128x128xf32, #tpu.memory_space<vmem>>, vector<1x128x128xf32>
    %69 = vector.shape_cast %68 : vector<1x128x128xf32> to vector<128x128xf32>
    %70 = vector.shape_cast %67 : vector<128x128xf32> to vector<1x128x128xf32>
    tpu.vector_store %arg17[%c0_58, %c0_59, %c0_60], %70 {strides = array<i32>} : memref<1x128x128xf32, #tpu.memory_space<vmem>>, vector<1x128x128xf32>,
    return
  }
  func.func @transform_0(%arg0: i32) -> (i32, i32, i32) {
    %c0_i32 = arith.constant 0 : i32
    %c0_i32_0 = arith.constant 0 : i32
    %c0_i32_1 = arith.constant 0 : i32
    return %arg0, %c0_i32, %c0_i32_0 : i32, i32, i32
  }
  func.func @transform_1(%arg0: i32) -> (i32, i32, i32) {
    %c0_i32 = arith.constant 0 : i32
    %c0_i32_0 = arith.constant 0 : i32
    %c0_i32_1 = arith.constant 0 : i32
    return %arg0, %c0_i32, %c0_i32_0 : i32, i32, i32
  }
  func.func @transform_2(%arg0: i32) -> (i32, i32, i32) {
    %c0_i32 = arith.constant 0 : i32
    %c0_i32_0 = arith.constant 0 : i32
    %c0_i32_1 = arith.constant 0 : i32
    return %arg0, %c0_i32, %c0_i32_0 : i32, i32, i32
  }
  func.func @transform_3(%arg0: i32) -> (i32, i32, i32) {
    %c0_i32 = arith.constant 0 : i32
    %c0_i32_0 = arith.constant 0 : i32
    %c0_i32_1 = arith.constant 0 : i32
    return %arg0, %c0_i32, %c0_i32_0 : i32, i32, i32
  }
  func.func @transform_4(%arg0: i32) -> (i32, i32) {
    %c0_i32 = arith.constant 0 : i32
    %c0_i32_0 = arith.constant 0 : i32
    %c0_i32_1 = arith.constant 0 : i32
    return %c0_i32, %c0_i32_0 : i32, i32
  }
  func.func @transform_5(%arg0: i32) -> (i32, i32) {
    %c0_i32 = arith.constant 0 : i32
    %c0_i32_0 = arith.constant 0 : i32
    %c0_i32_1 = arith.constant 0 : i32
    return %c0_i32, %c0_i32_0 : i32, i32
  }
  func.func @transform_6(%arg0: i32) -> (i32, i32) {
    %c0_i32 = arith.constant 0 : i32
    %c0_i32_0 = arith.constant 0 : i32
    %c0_i32_1 = arith.constant 0 : i32
    return %c0_i32, %c0_i32_0 : i32, i32
  }
  func.func @transform_7(%arg0: i32) -> (i32, i32) {
    %c0_i32 = arith.constant 0 : i32
    %c0_i32_0 = arith.constant 0 : i32
    %c0_i32_1 = arith.constant 0 : i32
    return %c0_i32, %c0_i32_0 : i32, i32
  }
  func.func @transform_8(%arg0: i32) -> (i32, i32) {
    %c0_i32 = arith.constant 0 : i32
    %c0_i32_0 = arith.constant 0 : i32
    %c0_i32_1 = arith.constant 0 : i32
    return %c0_i32, %c0_i32_0 : i32, i32
  }
  func.func @transform_9(%arg0: i32) -> (i32, i32) {
    %c0_i32 = arith.constant 0 : i32
    %c0_i32_0 = arith.constant 0 : i32
    %c0_i32_1 = arith.constant 0 : i32
    return %c0_i32, %c0_i32_0 : i32, i32
  }
  func.func @transform_10(%arg0: i32) -> (i32, i32) {
    %c0_i32 = arith.constant 0 : i32
    %c0_i32_0 = arith.constant 0 : i32
    %c0_i32_1 = arith.constant 0 : i32
    return %c0_i32, %c0_i32_0 : i32, i32
  }
  func.func @transform_11(%arg0: i32) -> (i32, i32) {
    %c0_i32 = arith.constant 0 : i32
    %c0_i32_0 = arith.constant 0 : i32
    %c0_i32_1 = arith.constant 0 : i32
    return %c0_i32, %c0_i32_0 : i32, i32
  }
  func.func @transform_12(%arg0: i32) -> (i32, i32) {
    %c0_i32 = arith.constant 0 : i32
    %c0_i32_0 = arith.constant 0 : i32
    %c0_i32_1 = arith.constant 0 : i32
    return %c0_i32, %c0_i32_0 : i32, i32
  }
  func.func @transform_13(%arg0: i32) -> (i32, i32) {
    %c0_i32 = arith.constant 0 : i32
    %c0_i32_0 = arith.constant 0 : i32
    %c0_i32_1 = arith.constant 0 : i32
    return %c0_i32, %c0_i32_0 : i32, i32
  }
  func.func @transform_14(%arg0: i32) -> (i32, i32) {
    %c0_i32 = arith.constant 0 : i32
    %c0_i32_0 = arith.constant 0 : i32
    %c0_i32_1 = arith.constant 0 : i32
    return %c0_i32, %c0_i32_0 : i32, i32
  }
  func.func @transform_15(%arg0: i32) -> (i32, i32) {
    %c0_i32 = arith.constant 0 : i32
    %c0_i32_0 = arith.constant 0 : i32
    %c0_i32_1 = arith.constant 0 : i32
    return %c0_i32, %c0_i32_0 : i32, i32
  }
  func.func @transform_16(%arg0: i32) -> (i32, i32, i32) {
    %c0_i32 = arith.constant 0 : i32
    %c0_i32_0 = arith.constant 0 : i32
    %c0_i32_1 = arith.constant 0 : i32
    return %arg0, %c0_i32, %c0_i32_0 : i32, i32, i32
  }
}

</mosaic_0001>

<bundles_post_ra>
// kernel: tpu_custom_call.1
= control target key start
LH: loop header
LB: loop body
LE: loop exit
PB: predicated region body
PF: predicated region fallthrough
CT: control target
= control target key end

     0   :  { %s6682_s0 = inlined_call_operand.vmem [shape: f32[2,128,128], index: 0, kind: input, shape index: {}]   ;;  %s6683_s1 = inlined_call_operand.vmem [shape: f32[2,128,16], index: 1, kind: input, shape index: {}]   ;;  %s6684_s2 = inlined_call_operand.vmem [shape: f32[2,128,128], index: 2, kind: input, shape index: {}]   ;;  %s6685_s3 = inlined_call_operand.vmem [shape: f32[2,128,16], index: 3, kind: input, shape index: {}]   ;;  %s6686_s4 = inlined_call_operand.vmem [shape: f32[16,32], index: 4, kind: input, shape index: {}]   ;;  %s6687_s5 = inlined_call_operand.vmem [shape: f32[1,32], index: 5, kind: input, shape index: {}]   ;;  %s6688_s6 = inlined_call_operand.vmem [shape: f32[32,16], index: 6, kind: input, shape index: {}]   ;;  %s6689_s7 = inlined_call_operand.vmem [shape: f32[1,16], index: 7, kind: input, shape index: {}]   ;;  %s6690_s8 = inlined_call_operand.vmem [shape: f32[16,8], index: 8, kind: input, shape index: {}]   ;;  %s6691_s9 = inlined_call_operand.vmem [shape: f32[1,8], index: 9, kind: input, shape index: {}]   ;;  %s6692_s10 = inlined_call_operand.vmem [shape: f32[8,8], index: 10, kind: input, shape index: {}]   ;;  %s6693_s11 = inlined_call_operand.vmem [shape: f32[8,8], index: 11, kind: input, shape index: {}]   ;;  %s6694_s12 = inlined_call_operand.vmem [shape: f32[16,128], index: 12, kind: input, shape index: {}]   ;;  %s6695_s13 = inlined_call_operand.vmem [shape: f32[16,128], index: 13, kind: input, shape index: {}]   ;;  %s6696_s14 = inlined_call_operand.vmem [shape: f32[128,16], index: 14, kind: input, shape index: {}]   ;;  %s6697_s15 = inlined_call_operand.vmem [shape: f32[128,16], index: 15, kind: input, shape index: {}]   ;;  %s6698_s16 = inlined_call_operand.hbm [shape: f32[2,128,128], index: 16, kind: output, shape index: {}]  }
   0x1   :  { %6699 = sst [smem:[#allocation5_spill]] %s6682_s0 }
   0x2   :  { %6700 = sst [smem:[#allocation6_spill]] %s6683_s1 }
   0x3   :  { %6701 = sst [smem:[#allocation7_spill]] %s6684_s2 }
   0x4   :  { %6702 = sst [smem:[#allocation8_spill]] %s6685_s3 }
   0x5   :  { %6703 = sst [smem:[#allocation9_spill]] %s6686_s4 }
   0x6   :  { %6704 = sst [smem:[#allocation10_spill]] %s6687_s5 }
   0x7   :  { %21 = vsyncpa [#allocation3], 0 }
   0x8   :  { %23 = vsyncpa [#allocation3 + $0x1], 0  ;;  %s5592_s21 = smov 0   ;;  %s5594_s22 = smov 0  }
   0x9   :  { %s5596_s23 = smov 0   ;;  %s5598_s24 = smov 0  }
   0xa LB: > { %s5613_s25 = sadd.s32 4294967295, %s5502_s24   ;;  %s4005_s26 = sadd.s32 4294967294, %s5502_s24   ;;  %s5502_s24 = sphi %s5598_s24, %s6716_s24   ;;  %s5498_s23 = sphi %s5596_s23, %s6715_s23   ;;  %s5494_s22 = sphi %s5594_s22, %s6714_s22   ;;  %s5490_s21 = sphi %s5592_s21, %s6713_s21  }
   0xb   : > { %s5617_s27 = sadd.s32 1, %s5502_s24   ;;  %s392_s28 = sadd.s32 1, %s5498_s23 }
   0xc   : > { %s389_s29 = ssub.s32 %s5502_s24, %s5617_s27  ;;  %p402_p0 = scmp.ne.s32.totalorder %s5498_s23, %s5494_s22 }
   0xd   : > { %p390_p1 = scmp.eq.s32.totalorder %s389_s29, 0  ;;  %p403_p2 = scmp.eq.s32.totalorder %s5613_s25, 1 }
   0xe   : > { %p408_p3 = scmp.ne.s32.totalorder %s5494_s22, %s5490_s21  ;;  %p409_p4 = scmp.eq.s32.totalorder %s4005_s26, 1 }
   0xf   : > { %s5628_s30 = scalar_select %p390_p1, %s5498_s23, %s392_s28  }
  0x10   : > { %p5630_p5 = por %p403_p2, %p402_p0  ;;  %p5634_p6 = por %p409_p4, %p408_p3 }
  0x11   : > { %p4008_p7 = scmp.ge.s32.totalorder %s5502_s24, 1  ;;  %p495_p8 = scmp.lt.s32.totalorder %s5502_s24, 3 }
  0x13   : > { %p496_p9 = pnand %p4008_p7, %p495_p8 }
  0x14   : > { %s6707_s4 = sld [smem:[#allocation9_spill]] (!%p496_p9)  ;;  %p560_p10 = scmp.lt.s32.totalorder (!%p496_p9), %s5613_s25, 1 }
  0x15   : > { %499 = sbr.rel (%p496_p9) target bundleno = 3259 (0xcbb), region = 84  ;;  %s6708_s1 = sld [smem:[#allocation6_spill]] (!%p496_p9) }
  0x16   : > { %s6709_s18 = sld [smem:[#allocation5_spill]] (!%p496_p9) }
  0x17   : > { %s6710_s5 = sld [smem:[#allocation10_spill]] (!%p496_p9) }
  0x18   : > { %s6711_s3 = sld [smem:[#allocation8_spill]] (!%p496_p9) }
  0x19   : > { %s6712_s2 = sld [smem:[#allocation7_spill]] (!%p496_p9) }
  0x1a   : > { %v5643_v0 = vld [vmem:[%s6707_s4 + $0x8] sm:$0xff]  ;;  %v5648_v1 = vld [vmem:[%s6707_s4] sm:$0xff]  ;;  %s561_s28 = scalar_select %p560_p10, %s5613_s25, 1  ;;  %vm623_vm0 = vcmask 130048   ;;  %v5770_v50 = vld [vmem:[%s6688_s6 + $0x18] sm:$0xff]  ;;  %vm984_vm1 = vcmask 261120  }
  0x1b   : > { %4625 = vmatprep.subr.mxu1 %v5643_v0  ;;  %4709 = vmatprep.subr.mxu0 %v5770_v50  ;;  %v5777_v51 = vld [vmem:[%s6688_s6 + $0x10] sm:$0xff]  ;;  %v5784_v52 = vld [vmem:[%s6688_s6 + $0x8] sm:$0xff]  ;;  %v5791_v53 = vld [vmem:[%s6688_s6] sm:$0xff]  ;;  %vm2922_vm2 = vcmask 64512  }
  0x1c   : > { %4626 = vmatpush3.msra.mxu1 %v5643_v0  ;;  %s5656_s29 = sshll.u32 %s561_s28, 7  ;;  %4710 = vmatpush3.msra.mxu0 %v5770_v50 }
  0x1d   : > { %4627 = vmatprep.subr.mxu1 %v5648_v1  ;;  %s5662_s20 = scalar_lea.vmem %s6708_s1, %s5656_s29  ;;  %s5700_s19 = scalar_lea.vmem %s6709_s18, %s5656_s29  ;;  %4711 = vmatprep.subr.mxu0 %v5777_v51  ;;  %v5798_v54 = vld [vmem:[%s6710_s5] ss:$0 sm:$0xff] }
  0x1e   : > { %4628 = vmatpush3.msra.mxu1 %v5648_v1  ;;  %v607_v2 = vld [vmem:[%s5662_s20] sm:$0xff]  ;;  %v608_v3 = vld [vmem:[%s5662_s20 + $0x8] sm:$0xff]  ;;  %v609_v4 = vld [vmem:[%s5662_s20 + $0x10] sm:$0xff]  ;;  %4712 = vmatpush3.msra.mxu0 %v5777_v51 }
  0x1f   : > { %4629 = vmatprep.mubr.msk.f32.mxu1 %vm623_vm0, %v607_v2  ;;  %v610_v5 = vld [vmem:[%s5662_s20 + $0x18] sm:$0xff]  ;;  %v611_v6 = vld [vmem:[%s5662_s20 + $0x20] sm:$0xff]  ;;  %v612_v7 = vld [vmem:[%s5662_s20 + $0x28] sm:$0xff]  ;;  %4713 = vmatprep.subr.mxu0 %v5784_v52  ;;  %s5982_s18 = scalar_lea.vmem %s6712_s2, %s5656_s29  ;;  %s557_s2 = sand.u32 1, %s5494_s22  }
  0x20   : > { %4630 = vmatmul.mubr.msk.f32.vlgmr.msra.gmra.mxu1 %vm623_vm0, %v608_v3  ;;  %v613_v8 = vld [vmem:[%s5662_s20 + $0x30] sm:$0xff]  ;;  %v614_v9 = vld [vmem:[%s5662_s20 + $0x38] sm:$0xff]  ;;  %v615_v10 = vld [vmem:[%s5662_s20 + $0x40] sm:$0xff]  ;;  %4714 = vmatpush3.msra.mxu0 %v5784_v52  ;;  %s4009_s1 = sshll.u32 %s557_s2, 7 }
  0x21   : > { %4632 = vmatprep.mubr.msk.f32.mxu1 %vm623_vm0, %v609_v4  ;;  %v616_v11 = vld [vmem:[%s5662_s20 + $0x48] sm:$0xff]  ;;  %v617_v12 = vld [vmem:[%s5662_s20 + $0x50] sm:$0xff]  ;;  %v618_v13 = vld [vmem:[%s5662_s20 + $0x58] sm:$0xff]  ;;  %4715 = vmatprep.subr.mxu0 %v5791_v53 }
  0x22   : > { %v619_v14 = vld [vmem:[%s5662_s20 + $0x60] sm:$0xff]  ;;  %v620_v15 = vld [vmem:[%s5662_s20 + $0x68] sm:$0xff]  ;;  %v621_v16 = vld [vmem:[%s5662_s20 + $0x70] sm:$0xff]  ;;  %4716 = vmatpush3.msra.mxu0 %v5791_v53 }
  0x23   : > { %v622_v17 = vld [vmem:[%s5662_s20 + $0x78] sm:$0xff]  ;;  %v5703_v18 = vld [vmem:[%s5700_s19] sm:$0xff]  ;;  %v5707_v35 = vld [vmem:[%s5700_s19 + $0x8] sm:$0xff]  ;;  %s5905_s20 = scalar_lea.vmem %s6711_s3, %s5656_s29  ;;  %s5504_s3 = smov [#allocation2]  }
  0x24   : > { %4633 = vmatmul.mubr.msk.f32.gmra.mxu1 %vm623_vm0, %v610_v5  ;;  %v5710_v36 = vld [vmem:[%s5700_s19 + $0x10] sm:$0xff]  ;;  %v5715_v37 = vld [vmem:[%s5700_s19 + $0x18] sm:$0xff]  ;;  %v5718_v38 = vld [vmem:[%s5700_s19 + $0x20] sm:$0xff]  ;;  %s5446_s28 = sshll.u32 %s5504_s3, 4  ;;  %s5447_s28 = int_to_ptr.vmem [resolvable:$false] %s5446_s28 }
  0x25   : > { %4635 = vmatprep.mubr.msk.f32.mxu1 %vm623_vm0, %v611_v6  ;;  %v5723_v39 = vld [vmem:[%s5700_s19 + $0x28] sm:$0xff]  ;;  %v5726_v40 = vld [vmem:[%s5700_s19 + $0x30] sm:$0xff]  ;;  %v5731_v41 = vld [vmem:[%s5700_s19 + $0x38] sm:$0xff] }
  0x26   : > { %v5734_v42 = vld [vmem:[%s5700_s19 + $0x40] sm:$0xff]  ;;  %v5739_v43 = vld [vmem:[%s5700_s19 + $0x48] sm:$0xff]  ;;  %v5742_v44 = vld [vmem:[%s5700_s19 + $0x50] sm:$0xff] }
  0x27   : > { %v5747_v45 = vld [vmem:[%s5700_s19 + $0x58] sm:$0xff]  ;;  %v5750_v46 = vld [vmem:[%s5700_s19 + $0x60] sm:$0xff]  ;;  %v5755_v47 = vld [vmem:[%s5700_s19 + $0x68] sm:$0xff] }
  0x28   : > { %4636 = vmatmul.mubr.msk.f32.gmra.mxu1 %vm623_vm0, %v612_v7  ;;  %v5758_v48 = vld [vmem:[%s5700_s19 + $0x70] sm:$0xff]  ;;  %v5763_v49 = vld [vmem:[%s5700_s19 + $0x78] sm:$0xff]  ;;  %s6613_s19 = scalar_lea.vmem [#allocation2], %s4009_s1  ;;  %s6642_s1 = scalar_lea.sflag [#allocation3], %s557_s2 }
  0x29   : > { %4638 = vmatprep.mubr.msk.f32.mxu1 %vm623_vm0, %v613_v8  ;;  %s3907_s26 = sshll.u32 %s6613_s19, 4  ;;  %s6636_s26 = int_to_ptr.vmem [resolvable:$true] %s3907_s26 }
  0x2a   : > { %p5449_p0 = scmp.lt.s32.totalorder %s6636_s26, %s5447_s28 }
  0x2c   : > { %4639 = vmatmul.mubr.msk.f32.gmra.mxu1 %vm623_vm0, %v614_v9 }
  0x2d   : > { %4641 = vmatprep.mubr.msk.f32.mxu1 %vm623_vm0, %v615_v10 }
  0x30   : > { %4642 = vmatmul.mubr.msk.f32.gmra.mxu1 %vm623_vm0, %v616_v11 }
  0x31   : > { %4644 = vmatprep.mubr.msk.f32.mxu1 %vm623_vm0, %v617_v12 }
  0x34   : > { %4645 = vmatmul.mubr.msk.f32.gmra.mxu1 %vm623_vm0, %v618_v13 }
  0x35   : > { %4647 = vmatprep.mubr.msk.f32.mxu1 %vm623_vm0, %v619_v14 }
  0x38   : > { %4648 = vmatmul.mubr.msk.f32.gmra.mxu1 %vm623_vm0, %v620_v15 }
  0x39   : > { %4650 = vmatprep.mubr.msk.f32.mxu1 %vm623_vm0, %v621_v16 }
  0x3c   : > { %4651 = vmatmul.mubr.msk.f32.gmra.mxu1 %vm623_vm0, %v622_v17 }
  0x3d   : > { %4685 = vmatprep.mubr.f32.mxu1 %v5703_v18 }
  0xe0   : > { %v4631_v19 = vpop.f32.mrf.mxu1 }
  0xe2   : > { %v738_v20 = vpop.f32.mrf.mxu1 }
  0xe4   : > { %v4634_v21 = vpop.f32.mrf.mxu1 }
  0xe6   : > { %v748_v22 = vpop.f32.mrf.mxu1 }
  0xe8   : > { %v4637_v23 = vpop.f32.mrf.mxu1 }
  0xea   : > { %v758_v24 = vpop.f32.mrf.mxu1 }
  0xec   : > { %v4640_v25 = vpop.f32.mrf.mxu1 }
  0xee   : > { %v768_v26 = vpop.f32.mrf.mxu1 }
  0xf0   : > { %v4643_v27 = vpop.f32.mrf.mxu1 }
  0xf2   : > { %v778_v28 = vpop.f32.mrf.mxu1 }
  0xf4   : > { %v4646_v29 = vpop.f32.mrf.mxu1 }
  0xf6   : > { %v788_v30 = vpop.f32.mrf.mxu1 }
  0xf8   : > { %v4649_v31 = vpop.f32.mrf.mxu1 }
  0xfa   : > { %v798_v32 = vpop.f32.mrf.mxu1 }
  0xfc   : > { %v4652_v33 = vpop.f32.mrf.mxu1 }
  0xfd   : > { %4653 = vmatprep.subr.mxu1 %v4652_v33 }
  0xfe   : > { %v808_v34 = vpop.f32.mrf.mxu1  ;;  %4654 = vmatpush3.msra.mxu1 %v4652_v33 }
  0xff   : > { %4655 = vmatprep.subr.mxu1 %v808_v34 }
 0x100   : > { %4656 = vmatpush3.msra.mxu1 %v808_v34 }
 0x101   : > { %4657 = vmatprep.subr.mxu1 %v4649_v31 }
 0x102   : > { %4658 = vmatpush3.msra.mxu1 %v4649_v31 }
 0x103   : > { %4659 = vmatprep.subr.mxu1 %v798_v32 }
 0x104   : > { %4660 = vmatpush3.msra.mxu1 %v798_v32 }
 0x105   : > { %4661 = vmatprep.subr.mxu1 %v4646_v29 }
 0x106   : > { %4662 = vmatpush3.msra.mxu1 %v4646_v29 }
 0x107   : > { %4663 = vmatprep.subr.mxu1 %v788_v30 }
 0x108   : > { %4664 = vmatpush3.msra.mxu1 %v788_v30 }
 0x109   : > { %4665 = vmatprep.subr.mxu1 %v4643_v27 }
 0x10a   : > { %4666 = vmatpush3.msra.mxu1 %v4643_v27 }
 0x10b   : > { %4667 = vmatprep.subr.mxu1 %v778_v28 }
 0x10c   : > { %4668 = vmatpush3.msra.mxu1 %v778_v28 }
 0x10d   : > { %4669 = vmatprep.subr.mxu1 %v4640_v25 }
 0x10e   : > { %4670 = vmatpush3.msra.mxu1 %v4640_v25 }
 0x10f   : > { %4671 = vmatprep.subr.mxu1 %v768_v26 }
 0x110   : > { %4672 = vmatpush3.msra.mxu1 %v768_v26 }
 0x111   : > { %4673 = vmatprep.subr.mxu1 %v4637_v23 }
 0x112   : > { %4674 = vmatpush3.msra.mxu1 %v4637_v23 }
 0x113   : > { %4675 = vmatprep.subr.mxu1 %v758_v24 }
 0x114   : > { %4676 = vmatpush3.msra.mxu1 %v758_v24 }
 0x115   : > { %4677 = vmatprep.subr.mxu1 %v4634_v21 }
 0x116   : > { %4678 = vmatpush3.msra.mxu1 %v4634_v21 }
 0x117   : > { %4679 = vmatprep.subr.mxu1 %v748_v22 }
 0x118   : > { %4680 = vmatpush3.msra.mxu1 %v748_v22 }
 0x119   : > { %4681 = vmatprep.subr.mxu1 %v4631_v19 }
 0x11a   : > { %4682 = vmatpush3.msra.mxu1 %v4631_v19 }
 0x11b   : > { %4683 = vmatprep.subr.mxu1 %v738_v20 }
 0x11c   : > { %4684 = vmatpush3.msra.mxu1 %v738_v20 }
 0x11d   : > { %4686 = vmatmul.mubr.f32.vlgmr.msra.gmra.mxu1 %v5707_v35 }
 0x11e   : > { %4688 = vmatprep.mubr.f32.mxu1 %v5710_v36 }
 0x121   : > { %4689 = vmatmul.mubr.f32.gmra.mxu1 %v5715_v37 }
 0x122   : > { %4691 = vmatprep.mubr.f32.mxu1 %v5718_v38 }
 0x125   : > { %4692 = vmatmul.mubr.f32.gmra.mxu1 %v5723_v39 }
 0x126   : > { %4694 = vmatprep.mubr.f32.mxu1 %v5726_v40 }
 0x129   : > { %4695 = vmatmul.mubr.f32.gmra.mxu1 %v5731_v41 }
 0x12a   : > { %4697 = vmatprep.mubr.f32.mxu1 %v5734_v42 }
 0x12d   : > { %4698 = vmatmul.mubr.f32.gmra.mxu1 %v5739_v43 }
 0x12e   : > { %4700 = vmatprep.mubr.f32.mxu1 %v5742_v44 }
 0x131   : > { %4701 = vmatmul.mubr.f32.gmra.mxu1 %v5747_v45 }
 0x132   : > { %4703 = vmatprep.mubr.f32.mxu1 %v5750_v46 }
 0x135   : > { %4704 = vmatmul.mubr.f32.gmra.mxu1 %v5755_v47 }
 0x136   : > { %4706 = vmatprep.mubr.f32.mxu1 %v5758_v48 }
 0x139   : > { %4707 = vmatmul.mubr.f32.gmra.mxu1 %v5763_v49 }
 0x13a   : > { %4773 = vmatprep.mubr.f32.mxu1 %v5703_v18 }
 0x1dd   : > { %v4687_v55 = vpop.f32.mrf.mxu1 }
 0x1de   : > { %v895_v56 = vadd.f32 %v4687_v55, %v5798_v54 }
 0x1df   : > { %v889_v57 = vpop.f32.mrf.mxu1 }
 0x1e0   : > { %v890_v58 = vadd.f32 %v5798_v54, %v889_v57  ;;  %v969_v61 = vmax.f32 %v895_v56, 0.0 }
 0x1e1   : > { %v4690_v59 = vpop.f32.mrf.mxu1 }
 0x1e2   : > { %v968_v60 = vmax.f32 %v890_v58, 0.0  ;;  %v905_v62 = vadd.f32 %v4690_v59, %v5798_v54 }
 0x1e3   : > { %v899_v63 = vpop.f32.mrf.mxu1 }
 0x1e4   : > { %v900_v2 = vadd.f32 %v5798_v54, %v899_v63  ;;  %4717 = vmatprep.mubr.msk.f32.mxu0 %vm984_vm1, %v968_v60  ;;  %v971_v5 = vmax.f32 %v905_v62, 0.0  ;;  %v5835_v62 = vld [vmem:[%s6690_s8 + $0x8] sm:$0xff]  ;;  %v5840_v63 = vld [vmem:[%s6690_s8] sm:$0xff] }
 0x1e5   : > { %v4693_v3 = vpop.f32.mrf.mxu1  ;;  %4718 = vmatmul.mubr.msk.f32.vlgmr.msra.gmra.mxu0 %vm984_vm1, %v969_v61  ;;  %4797 = vmatprep.subr.mxu0 %v5835_v62 }
 0x1e6   : > { %v970_v4 = vmax.f32 %v900_v2, 0.0  ;;  %v915_v6 = vadd.f32 %v4693_v3, %v5798_v54  ;;  %4798 = vmatpush3.msra.mxu0 %v5835_v62 }
 0x1e7   : > { %v909_v7 = vpop.f32.mrf.mxu1  ;;  %4799 = vmatprep.subr.mxu0 %v5840_v63 }
 0x1e8   : > { %v910_v8 = vadd.f32 %v5798_v54, %v909_v7  ;;  %4720 = vmatprep.mubr.msk.f32.mxu0 %vm984_vm1, %v970_v4  ;;  %v973_v11 = vmax.f32 %v915_v6, 0.0  ;;  %4800 = vmatpush3.msra.mxu0 %v5840_v63 }
 0x1e9   : > { %v4696_v9 = vpop.f32.mrf.mxu1  ;;  %4721 = vmatmul.mubr.msk.f32.gmra.mxu0 %vm984_vm1, %v971_v5  ;;  %4881 = vmatprep.subr.mxu0 %v5643_v0 }
 0x1ea   : > { %v972_v10 = vmax.f32 %v910_v8, 0.0  ;;  %v925_v12 = vadd.f32 %v4696_v9, %v5798_v54 }
 0x1eb   : > { %v919_v13 = vpop.f32.mrf.mxu1 }
 0x1ec   : > { %v920_v14 = vadd.f32 %v5798_v54, %v919_v13  ;;  %4723 = vmatprep.mubr.msk.f32.mxu0 %vm984_vm1, %v972_v10  ;;  %v975_v17 = vmax.f32 %v925_v12, 0.0 }
 0x1ed   : > { %v4699_v15 = vpop.f32.mrf.mxu1  ;;  %4724 = vmatmul.mubr.msk.f32.gmra.mxu0 %vm984_vm1, %v973_v11 }
 0x1ee   : > { %v974_v16 = vmax.f32 %v920_v14, 0.0  ;;  %v935_v19 = vadd.f32 %v4699_v15, %v5798_v54 }
 0x1ef   : > { %v929_v20 = vpop.f32.mrf.mxu1 }
 0x1f0   : > { %v930_v21 = vadd.f32 %v5798_v54, %v929_v20  ;;  %4726 = vmatprep.mubr.msk.f32.mxu0 %vm984_vm1, %v974_v16  ;;  %v977_v24 = vmax.f32 %v935_v19, 0.0  ;;  %v5866_v19 = vld [vmem:[%s6689_s7] ss:$0 sm:$0xff] }
 0x1f1   : > { %v4702_v22 = vpop.f32.mrf.mxu1  ;;  %4727 = vmatmul.mubr.msk.f32.gmra.mxu0 %vm984_vm1, %v975_v17 }
 0x1f2   : > { %v976_v23 = vmax.f32 %v930_v21, 0.0  ;;  %v945_v25 = vadd.f32 %v4702_v22, %v5798_v54 }
 0x1f3   : > { %v939_v26 = vpop.f32.mrf.mxu1 }
 0x1f4   : > { %v940_v27 = vadd.f32 %v5798_v54, %v939_v26  ;;  %4729 = vmatprep.mubr.msk.f32.mxu0 %vm984_vm1, %v976_v23  ;;  %v979_v30 = vmax.f32 %v945_v25, 0.0 }
 0x1f5   : > { %v4705_v28 = vpop.f32.mrf.mxu1  ;;  %4730 = vmatmul.mubr.msk.f32.gmra.mxu0 %vm984_vm1, %v977_v24 }
 0x1f6   : > { %v978_v29 = vmax.f32 %v940_v27, 0.0  ;;  %v955_v31 = vadd.f32 %v4705_v28, %v5798_v54 }
 0x1f7   : > { %v949_v32 = vpop.f32.mrf.mxu1 }
 0x1f8   : > { %v950_v33 = vadd.f32 %v5798_v54, %v949_v32  ;;  %4732 = vmatprep.mubr.msk.f32.mxu0 %vm984_vm1, %v978_v29  ;;  %v981_v56 = vmax.f32 %v955_v31, 0.0 }
 0x1f9   : > { %v4708_v34 = vpop.f32.mrf.mxu1  ;;  %4733 = vmatmul.mubr.msk.f32.gmra.mxu0 %vm984_vm1, %v979_v30 }
 0x1fa   : > { %v980_v55 = vmax.f32 %v950_v33, 0.0  ;;  %v965_v57 = vadd.f32 %v4708_v34, %v5798_v54 }
 0x1fb   : > { %v959_v58 = vpop.f32.mrf.mxu1 }
 0x1fc   : > { %v960_v59 = vadd.f32 %v5798_v54, %v959_v58  ;;  %4735 = vmatprep.mubr.msk.f32.mxu0 %vm984_vm1, %v980_v55  ;;  %v983_v61 = vmax.f32 %v965_v57, 0.0 }
 0x1fd   : > { %4736 = vmatmul.mubr.msk.f32.gmra.mxu0 %vm984_vm1, %v981_v56 }
 0x1fe   : > { %v982_v60 = vmax.f32 %v960_v59, 0.0 }
 0x200   : > { %4738 = vmatprep.mubr.msk.f32.mxu0 %vm984_vm1, %v982_v60 }
 0x201   : > { %4739 = vmatmul.mubr.msk.f32.gmra.mxu0 %vm984_vm1, %v983_v61 }
 0x2a5   : > { %v4719_v2 = vpop.f32.mrf.mxu0 }
 0x2a7   : > { %v1099_v3 = vpop.f32.mrf.mxu0 }
 0x2a9   : > { %v4722_v4 = vpop.f32.mrf.mxu0 }
 0x2ab   : > { %v1109_v5 = vpop.f32.mrf.mxu0 }
 0x2ad   : > { %v4725_v6 = vpop.f32.mrf.mxu0 }
 0x2af   : > { %v1119_v7 = vpop.f32.mrf.mxu0 }
 0x2b1   : > { %v4728_v8 = vpop.f32.mrf.mxu0 }
 0x2b3   : > { %v1129_v9 = vpop.f32.mrf.mxu0 }
 0x2b5   : > { %v4731_v10 = vpop.f32.mrf.mxu0 }
 0x2b7   : > { %v1139_v11 = vpop.f32.mrf.mxu0 }
 0x2b9   : > { %v4734_v12 = vpop.f32.mrf.mxu0 }
 0x2bb   : > { %v1149_v13 = vpop.f32.mrf.mxu0 }
 0x2bd   : > { %v4737_v14 = vpop.f32.mrf.mxu0 }
 0x2bf   : > { %v1159_v15 = vpop.f32.mrf.mxu0 }
 0x2c1   : > { %v4740_v16 = vpop.f32.mrf.mxu0 }
 0x2c2   : > { %4741 = vmatprep.subr.mxu1 %v4740_v16 }
 0x2c3   : > { %v1169_v17 = vpop.f32.mrf.mxu0  ;;  %4742 = vmatpush3.msra.mxu1 %v4740_v16 }
 0x2c4   : > { %4743 = vmatprep.subr.mxu1 %v1169_v17 }
 0x2c5   : > { %4744 = vmatpush3.msra.mxu1 %v1169_v17 }
 0x2c6   : > { %4745 = vmatprep.subr.mxu1 %v4737_v14 }
 0x2c7   : > { %4746 = vmatpush3.msra.mxu1 %v4737_v14 }
 0x2c8   : > { %4747 = vmatprep.subr.mxu1 %v1159_v15 }
 0x2c9   : > { %4748 = vmatpush3.msra.mxu1 %v1159_v15 }
 0x2ca   : > { %4749 = vmatprep.subr.mxu1 %v4734_v12 }
 0x2cb   : > { %4750 = vmatpush3.msra.mxu1 %v4734_v12 }
 0x2cc   : > { %4751 = vmatprep.subr.mxu1 %v1149_v13 }
 0x2cd   : > { %4752 = vmatpush3.msra.mxu1 %v1149_v13 }
 0x2ce   : > { %4753 = vmatprep.subr.mxu1 %v4731_v10 }
 0x2cf   : > { %4754 = vmatpush3.msra.mxu1 %v4731_v10 }
 0x2d0   : > { %4755 = vmatprep.subr.mxu1 %v1139_v11 }
 0x2d1   : > { %4756 = vmatpush3.msra.mxu1 %v1139_v11 }
 0x2d2   : > { %4757 = vmatprep.subr.mxu1 %v4728_v8 }
 0x2d3   : > { %4758 = vmatpush3.msra.mxu1 %v4728_v8 }
 0x2d4   : > { %4759 = vmatprep.subr.mxu1 %v1129_v9 }
 0x2d5   : > { %4760 = vmatpush3.msra.mxu1 %v1129_v9 }
 0x2d6   : > { %4761 = vmatprep.subr.mxu1 %v4725_v6 }
 0x2d7   : > { %4762 = vmatpush3.msra.mxu1 %v4725_v6 }
 0x2d8   : > { %4763 = vmatprep.subr.mxu1 %v1119_v7 }
 0x2d9   : > { %4764 = vmatpush3.msra.mxu1 %v1119_v7 }
 0x2da   : > { %4765 = vmatprep.subr.mxu1 %v4722_v4 }
 0x2db   : > { %4766 = vmatpush3.msra.mxu1 %v4722_v4 }
 0x2dc   : > { %4767 = vmatprep.subr.mxu1 %v1109_v5 }
 0x2dd   : > { %4768 = vmatpush3.msra.mxu1 %v1109_v5 }
 0x2de   : > { %4769 = vmatprep.subr.mxu1 %v4719_v2 }
 0x2df   : > { %4770 = vmatpush3.msra.mxu1 %v4719_v2 }
 0x2e0   : > { %4771 = vmatprep.subr.mxu1 %v1099_v3 }
 0x2e1   : > { %4772 = vmatpush3.msra.mxu1 %v1099_v3 }
 0x2e2   : > { %4774 = vmatmul.mubr.f32.vlgmr.msra.gmra.mxu1 %v5707_v35 }
 0x2e3   : > { %4776 = vmatprep.mubr.f32.mxu1 %v5710_v36 }
 0x2e6   : > { %4777 = vmatmul.mubr.f32.gmra.mxu1 %v5715_v37 }
 0x2e7   : > { %4779 = vmatprep.mubr.f32.mxu1 %v5718_v38 }
 0x2ea   : > { %4780 = vmatmul.mubr.f32.gmra.mxu1 %v5723_v39 }
 0x2eb   : > { %4782 = vmatprep.mubr.f32.mxu1 %v5726_v40 }
 0x2ee   : > { %4783 = vmatmul.mubr.f32.gmra.mxu1 %v5731_v41 }
 0x2ef   : > { %4785 = vmatprep.mubr.f32.mxu1 %v5734_v42 }
 0x2f2   : > { %4786 = vmatmul.mubr.f32.gmra.mxu1 %v5739_v43 }
 0x2f3   : > { %4788 = vmatprep.mubr.f32.mxu1 %v5742_v44 }
 0x2f6   : > { %4789 = vmatmul.mubr.f32.gmra.mxu1 %v5747_v45 }
 0x2f7   : > { %4791 = vmatprep.mubr.f32.mxu1 %v5750_v46 }
 0x2fa   : > { %4792 = vmatmul.mubr.f32.gmra.mxu1 %v5755_v47 }
 0x2fb   : > { %4794 = vmatprep.mubr.f32.mxu1 %v5758_v48 }
 0x2fe   : > { %4795 = vmatmul.mubr.f32.gmra.mxu1 %v5763_v49 }
 0x2ff   : > { %4857 = vmatprep.mubr.f32.mxu1 %v5703_v18 }
 0x3a2   : > { %v4775_v20 = vpop.f32.mrf.mxu1 }
 0x3a3   : > { %v1256_v21 = vadd.f32 %v4775_v20, %v5866_v19 }
 0x3a4   : > { %v1250_v22 = vpop.f32.mrf.mxu1 }
 0x3a5   : > { %v1251_v23 = vadd.f32 %v5866_v19, %v1250_v22  ;;  %v1330_v26 = vmax.f32 %v1256_v21, 0.0 }
 0x3a6   : > { %v4778_v24 = vpop.f32.mrf.mxu1 }
 0x3a7   : > { %v1329_v25 = vmax.f32 %v1251_v23, 0.0  ;;  %v1266_v27 = vadd.f32 %v4778_v24, %v5866_v19 }
 0x3a8   : > { %v1260_v28 = vpop.f32.mrf.mxu1 }
 0x3a9   : > { %v1261_v29 = vadd.f32 %v5866_v19, %v1260_v28  ;;  %4801 = vmatprep.mubr.msk.f32.mxu0 %vm623_vm0, %v1329_v25  ;;  %v1332_v31 = vmax.f32 %v1266_v27, 0.0  ;;  %v1705_v27 = vld [vmem:[%s5905_s20] sm:$0xff]  ;;  %v1706_v28 = vld [vmem:[%s5905_s20 + $0x8] sm:$0xff] }
 0x3aa   : > { %v4781_v18 = vpop.f32.mrf.mxu1  ;;  %4802 = vmatmul.mubr.msk.f32.vlgmr.msra.gmra.mxu0 %vm623_vm0, %v1330_v26 }
 0x3ab   : > { %v1331_v30 = vmax.f32 %v1261_v29, 0.0  ;;  %4882 = vmatpush3.msra.mxu0 %v5643_v0  ;;  %v1276_v32 = vadd.f32 %v4781_v18, %v5866_v19  ;;  %v1707_v29 = vld [vmem:[%s5905_s20 + $0x10] sm:$0xff]  ;;  %v1708_v18 = vld [vmem:[%s5905_s20 + $0x18] sm:$0xff] }
 0x3ac   : > { %v1270_v33 = vpop.f32.mrf.mxu1  ;;  %4883 = vmatprep.subr.mxu0 %v5648_v1 }
 0x3ad   : > { %v1271_v34 = vadd.f32 %v5866_v19, %v1270_v33  ;;  %4804 = vmatprep.mubr.msk.f32.mxu0 %vm623_vm0, %v1331_v30  ;;  %4884 = vmatpush3.msra.mxu0 %v5648_v1  ;;  %v1334_v57 = vmax.f32 %v1276_v32, 0.0  ;;  %v1709_v30 = vld [vmem:[%s5905_s20 + $0x20] sm:$0xff]  ;;  %v1715_v33 = vld [vmem:[%s5905_s20 + $0x50] sm:$0xff] }
 0x3ae   : > { %v4784_v55 = vpop.f32.mrf.mxu1  ;;  %4805 = vmatmul.mubr.msk.f32.gmra.mxu0 %vm623_vm0, %v1332_v31  ;;  %4965 = vmatprep.subr.mxu0 %v5770_v50  ;;  %v1710_v31 = vld [vmem:[%s5905_s20 + $0x28] sm:$0xff]  ;;  %v1713_v32 = vld [vmem:[%s5905_s20 + $0x40] sm:$0xff] }
 0x3af   : > { %v1333_v56 = vmax.f32 %v1271_v34, 0.0  ;;  %v1286_v0 = vadd.f32 %v4784_v55, %v5866_v19  ;;  %v1717_v34 = vld [vmem:[%s5905_s20 + $0x60] sm:$0xff]  ;;  %v1718_v55 = vld [vmem:[%s5905_s20 + $0x68] sm:$0xff] }
 0x3b0   : > { %v1280_v58 = vpop.f32.mrf.mxu1 }
 0x3b1   : > { %v1281_v59 = vadd.f32 %v5866_v19, %v1280_v58  ;;  %4807 = vmatprep.mubr.msk.f32.mxu0 %vm623_vm0, %v1333_v56  ;;  %v1336_v2 = vmax.f32 %v1286_v0, 0.0  ;;  %v1719_v56 = vld [vmem:[%s5905_s20 + $0x70] sm:$0xff] }
 0x3b2   : > { %v4787_v60 = vpop.f32.mrf.mxu1  ;;  %4808 = vmatmul.mubr.msk.f32.gmra.mxu0 %vm623_vm0, %v1334_v57  ;;  %v1720_v57 = vld [vmem:[%s5905_s20 + $0x78] sm:$0xff] }
 0x3b3   : > { %v1335_v61 = vmax.f32 %v1281_v59, 0.0  ;;  %v1296_v1 = vadd.f32 %v4787_v60, %v5866_v19 }
 0x3b4   : > { %v1290_v3 = vpop.f32.mrf.mxu1 }
 0x3b5   : > { %v1291_v4 = vadd.f32 %v5866_v19, %v1290_v3  ;;  %4810 = vmatprep.mubr.msk.f32.mxu0 %vm623_vm0, %v1335_v61  ;;  %v1338_v7 = vmax.f32 %v1296_v1, 0.0 }
 0x3b6   : > { %v4790_v5 = vpop.f32.mrf.mxu1  ;;  %4811 = vmatmul.mubr.msk.f32.gmra.mxu0 %vm623_vm0, %v1336_v2 }
 0x3b7   : > { %v1337_v6 = vmax.f32 %v1291_v4, 0.0  ;;  %v1306_v8 = vadd.f32 %v4790_v5, %v5866_v19 }
 0x3b8   : > { %v1300_v9 = vpop.f32.mrf.mxu1 }
 0x3b9   : > { %v1301_v10 = vadd.f32 %v5866_v19, %v1300_v9  ;;  %4813 = vmatprep.mubr.msk.f32.mxu0 %vm623_vm0, %v1337_v6  ;;  %v1340_v13 = vmax.f32 %v1306_v8, 0.0 }
 0x3ba   : > { %v4793_v11 = vpop.f32.mrf.mxu1  ;;  %4814 = vmatmul.mubr.msk.f32.gmra.mxu0 %vm623_vm0, %v1338_v7 }
 0x3bb   : > { %v1339_v12 = vmax.f32 %v1301_v10, 0.0  ;;  %v1316_v14 = vadd.f32 %v4793_v11, %v5866_v19 }
 0x3bc   : > { %v1310_v15 = vpop.f32.mrf.mxu1 }
 0x3bd   : > { %v1311_v16 = vadd.f32 %v5866_v19, %v1310_v15  ;;  %4816 = vmatprep.mubr.msk.f32.mxu0 %vm623_vm0, %v1339_v12  ;;  %v1342_v21 = vmax.f32 %v1316_v14, 0.0 }
 0x3be   : > { %v4796_v17 = vpop.f32.mrf.mxu1  ;;  %4817 = vmatmul.mubr.msk.f32.gmra.mxu0 %vm623_vm0, %v1340_v13 }
 0x3bf   : > { %v1341_v20 = vmax.f32 %v1311_v16, 0.0  ;;  %v1326_v22 = vadd.f32 %v4796_v17, %v5866_v19 }
 0x3c0   : > { %v1320_v23 = vpop.f32.mrf.mxu1 }
 0x3c1   : > { %v1321_v24 = vadd.f32 %v5866_v19, %v1320_v23  ;;  %4819 = vmatprep.mubr.msk.f32.mxu0 %vm623_vm0, %v1341_v20  ;;  %v1344_v26 = vmax.f32 %v1326_v22, 0.0 }
 0x3c2   : > { %4820 = vmatmul.mubr.msk.f32.gmra.mxu0 %vm623_vm0, %v1342_v21 }
 0x3c3   : > { %v1343_v25 = vmax.f32 %v1321_v24, 0.0 }
 0x3c5   : > { %4822 = vmatprep.mubr.msk.f32.mxu0 %vm623_vm0, %v1343_v25 }
 0x3c6   : > { %4823 = vmatmul.mubr.msk.f32.gmra.mxu0 %vm623_vm0, %v1344_v26 }
 0x3c7   : > { %4885 = vmatprep.mubr.msk.f32.mxu0 %vm623_vm0, %v1705_v27 }
 0x3ca   : > { %4886 = vmatmul.mubr.msk.f32.vlgmr.msra.gmra.mxu0 %vm623_vm0, %v1706_v28 }
 0x3cb   : > { %4888 = vmatprep.mubr.msk.f32.mxu0 %vm623_vm0, %v1707_v29  ;;  %4966 = vmatpush3.msra.mxu0 %v5770_v50  ;;  %v1711_v50 = vld [vmem:[%s5905_s20 + $0x30] sm:$0xff] }
 0x3cc   : > { %4967 = vmatprep.subr.mxu0 %v5777_v51 }
 0x3cd   : > { %4968 = vmatpush3.msra.mxu0 %v5777_v51  ;;  %v1712_v51 = vld [vmem:[%s5905_s20 + $0x38] sm:$0xff] }
 0x3ce   : > { %4889 = vmatmul.mubr.msk.f32.gmra.mxu0 %vm623_vm0, %v1708_v18  ;;  %4969 = vmatprep.subr.mxu0 %v5784_v52  ;;  %v6056_v18 = vld [vmem:[%s5982_s18 + $0x78] sm:$0xff] }
 0x3cf   : > { %4891 = vmatprep.mubr.msk.f32.mxu0 %vm623_vm0, %v1709_v30  ;;  %4970 = vmatpush3.msra.mxu0 %v5784_v52  ;;  %v1714_v52 = vld [vmem:[%s5905_s20 + $0x48] sm:$0xff] }
 0x3d0   : > { %4971 = vmatprep.subr.mxu0 %v5791_v53 }
 0x3d1   : > { %4972 = vmatpush3.msra.mxu0 %v5791_v53  ;;  %v1716_v53 = vld [vmem:[%s5905_s20 + $0x58] sm:$0xff]  ;;  %s4210_s20 = sshll.u32 %s5613_s25, 11  ;;  %s5442_s25 = scalar_lea.vmem %s6636_s26, 2048 }
 0x3d2   : > { %4892 = vmatmul.mubr.msk.f32.gmra.mxu0 %vm623_vm0, %v1710_v31  ;;  %5053 = vmatprep.subr.mxu0 %v5835_v62  ;;  %s6634_s29 = scalar_lea.hbm %s6698_s16, %s4210_s20  ;;  %p5443_p11 = scmp.ne.s32.totalorder %s6636_s26, %s5442_s25 }
 0x3d3   : > { %4894 = vmatprep.mubr.msk.f32.mxu0 %vm623_vm0, %v1711_v50  ;;  %s5448_s20 = scalar_lea.vmem %s5447_s28, 4096 }
 0x3d4   : > { %p5444_p12 = pnand %p5443_p11, %p5630_p5  ;;  %p5450_p1 = scmp.lt.s32.totalorder %s5448_s20, %s5442_s25 }
 0x3d6   : > { %4895 = vmatmul.mubr.msk.f32.gmra.mxu0 %vm623_vm0, %v1712_v51  ;;  %p5445_p13 = pneg %p5444_p12  ;;  %p5451_p2 = por %p5450_p1, %p5449_p0 }
 0x3d7   : > { %4897 = vmatprep.mubr.msk.f32.mxu0 %vm623_vm0, %v1713_v32 }
 0x3d8   : > { %p5452_p3 = pnand %p5451_p2, %p5445_p13 }
 0x3da   : > { %4898 = vmatmul.mubr.msk.f32.gmra.mxu0 %vm623_vm0, %v1714_v52 }
 0x3db   : > { %4900 = vmatprep.mubr.msk.f32.mxu0 %vm623_vm0, %v1715_v33 }
 0x3de   : > { %4901 = vmatmul.mubr.msk.f32.gmra.mxu0 %vm623_vm0, %v1716_v53 }
 0x3df   : > { %4903 = vmatprep.mubr.msk.f32.mxu0 %vm623_vm0, %v1717_v34 }
 0x3e2   : > { %4904 = vmatmul.mubr.msk.f32.gmra.mxu0 %vm623_vm0, %v1718_v55 }
 0x3e3   : > { %4906 = vmatprep.mubr.msk.f32.mxu0 %vm623_vm0, %v1719_v56 }
 0x3e6   : > { %4907 = vmatmul.mubr.msk.f32.gmra.mxu0 %vm623_vm0, %v1720_v57 }
 0x46a   : > { %v4803_v0 = vpop.f32.mrf.mxu0 }
 0x46c   : > { %v1459_v58 = vpop.f32.mrf.mxu0 }
 0x46e   : > { %v4806_v59 = vpop.f32.mrf.mxu0 }
 0x470   : > { %v1469_v60 = vpop.f32.mrf.mxu0 }
 0x472   : > { %v4809_v61 = vpop.f32.mrf.mxu0 }
 0x474   : > { %v1479_v2 = vpop.f32.mrf.mxu0 }
 0x476   : > { %v4812_v1 = vpop.f32.mrf.mxu0 }
 0x478   : > { %v1489_v3 = vpop.f32.mrf.mxu0 }
 0x47a   : > { %v4815_v4 = vpop.f32.mrf.mxu0 }
 0x47c   : > { %v1499_v5 = vpop.f32.mrf.mxu0 }
 0x47e   : > { %v4818_v6 = vpop.f32.mrf.mxu0 }
 0x480   : > { %v1509_v7 = vpop.f32.mrf.mxu0 }
 0x482   : > { %v4821_v8 = vpop.f32.mrf.mxu0 }
 0x484   : > { %v1519_v9 = vpop.f32.mrf.mxu0 }
 0x486   : > { %v4824_v10 = vpop.f32.mrf.mxu0 }
 0x487   : > { %4825 = vmatprep.subr.mxu1 %v4824_v10 }
 0x488   : > { %v1529_v11 = vpop.f32.mrf.mxu0  ;;  %4826 = vmatpush3.msra.mxu1 %v4824_v10 }
 0x489   : > { %4827 = vmatprep.subr.mxu1 %v1529_v11 }
 0x48a   : > { %4828 = vmatpush3.msra.mxu1 %v1529_v11  ;;  %v5950_v12 = vpop.f32.mrf.mxu0  ;;  %v6099_v11 = vld [vmem:[%s6691_s9] ss:$0 sm:$0xff] }
 0x48b   : > { %4829 = vmatprep.subr.mxu1 %v4821_v8 }
 0x48c   : > { %4830 = vmatpush3.msra.mxu1 %v4821_v8  ;;  %v5952_v13 = vpop.f32.mrf.mxu0 }
 0x48d   : > { %4831 = vmatprep.subr.mxu1 %v1519_v9 }
 0x48e   : > { %4832 = vmatpush3.msra.mxu1 %v1519_v9  ;;  %v5954_v14 = vpop.f32.mrf.mxu0 }
 0x48f   : > { %4833 = vmatprep.subr.mxu1 %v4818_v6 }
 0x490   : > { %4834 = vmatpush3.msra.mxu1 %v4818_v6  ;;  %v5956_v15 = vpop.f32.mrf.mxu0 }
 0x491   : > { %4835 = vmatprep.subr.mxu1 %v1509_v7 }
 0x492   : > { %4836 = vmatpush3.msra.mxu1 %v1509_v7  ;;  %v5958_v16 = vpop.f32.mrf.mxu0 }
 0x493   : > { %4837 = vmatprep.subr.mxu1 %v4815_v4 }
 0x494   : > { %4838 = vmatpush3.msra.mxu1 %v4815_v4  ;;  %v5960_v17 = vpop.f32.mrf.mxu0 }
 0x495   : > { %4839 = vmatprep.subr.mxu1 %v1499_v5 }
 0x496   : > { %4840 = vmatpush3.msra.mxu1 %v1499_v5  ;;  %v4896_v20 = vpop.f32.mrf.mxu0 }
 0x497   : > { %4841 = vmatprep.subr.mxu1 %v4812_v1 }
 0x498   : > { %4842 = vmatpush3.msra.mxu1 %v4812_v1  ;;  %v1865_v21 = vpop.f32.mrf.mxu0 }
 0x499   : > { %4843 = vmatprep.subr.mxu1 %v1489_v3 }
 0x49a   : > { %4844 = vmatpush3.msra.mxu1 %v1489_v3  ;;  %v4899_v22 = vpop.f32.mrf.mxu0 }
 0x49b   : > { %4845 = vmatprep.subr.mxu1 %v4809_v61 }
 0x49c   : > { %4846 = vmatpush3.msra.mxu1 %v4809_v61  ;;  %v1875_v23 = vpop.f32.mrf.mxu0 }
 0x49d   : > { %4847 = vmatprep.subr.mxu1 %v1479_v2 }
 0x49e   : > { %4848 = vmatpush3.msra.mxu1 %v1479_v2  ;;  %v4902_v24 = vpop.f32.mrf.mxu0 }
 0x49f   : > { %4849 = vmatprep.subr.mxu1 %v4806_v59 }
 0x4a0   : > { %4850 = vmatpush3.msra.mxu1 %v4806_v59  ;;  %v1885_v25 = vpop.f32.mrf.mxu0 }
 0x4a1   : > { %4851 = vmatprep.subr.mxu1 %v1469_v60 }
 0x4a2   : > { %4852 = vmatpush3.msra.mxu1 %v1469_v60  ;;  %v4905_v26 = vpop.f32.mrf.mxu0 }
 0x4a3   : > { %4853 = vmatprep.subr.mxu1 %v4803_v0 }
 0x4a4   : > { %4854 = vmatpush3.msra.mxu1 %v4803_v0  ;;  %v1895_v27 = vpop.f32.mrf.mxu0 }
 0x4a5   : > { %4855 = vmatprep.subr.mxu1 %v1459_v58 }
 0x4a6   : > { %4856 = vmatpush3.msra.mxu1 %v1459_v58  ;;  %v4908_v28 = vpop.f32.mrf.mxu0 }
 0x4a7   : > { %4858 = vmatmul.mubr.f32.vlgmr.msra.gmra.mxu1 %v5707_v35  ;;  %4909 = vmatprep.subr.mxu1 %v4908_v28  ;;  %v5990_v35 = vld [vmem:[%s5982_s18] sm:$0xff] }
 0x4a8   : > { %v1905_v29 = vpop.f32.mrf.mxu0  ;;  %4910 = vmatpush3.msra.mxu1 %v4908_v28  ;;  %4860 = vmatprep.mubr.f32.mxu1 %v5710_v36  ;;  %v5998_v36 = vld [vmem:[%s5982_s18 + $0x8] sm:$0xff] }
 0x4a9   : > { %4911 = vmatprep.subr.mxu1 %v1905_v29 }
 0x4aa   : > { %4912 = vmatpush3.msra.mxu1 %v1905_v29 }
 0x4ab   : > { %4861 = vmatmul.mubr.f32.gmra.mxu1 %v5715_v37  ;;  %4913 = vmatprep.subr.mxu1 %v4905_v26  ;;  %v6002_v37 = vld [vmem:[%s5982_s18 + $0x10] sm:$0xff] }
 0x4ac   : > { %4914 = vmatpush3.msra.mxu1 %v4905_v26  ;;  %4863 = vmatprep.mubr.f32.mxu1 %v5718_v38  ;;  %v6008_v38 = vld [vmem:[%s5982_s18 + $0x18] sm:$0xff] }
 0x4ad   : > { %4915 = vmatprep.subr.mxu1 %v1895_v27 }
 0x4ae   : > { %4916 = vmatpush3.msra.mxu1 %v1895_v27 }
 0x4af   : > { %4864 = vmatmul.mubr.f32.gmra.mxu1 %v5723_v39  ;;  %4917 = vmatprep.subr.mxu1 %v4902_v24  ;;  %v6011_v39 = vld [vmem:[%s5982_s18 + $0x20] sm:$0xff] }
 0x4b0   : > { %4918 = vmatpush3.msra.mxu1 %v4902_v24  ;;  %4866 = vmatprep.mubr.f32.mxu1 %v5726_v40  ;;  %v6016_v40 = vld [vmem:[%s5982_s18 + $0x28] sm:$0xff] }
 0x4b1   : > { %4919 = vmatprep.subr.mxu1 %v1885_v25 }
 0x4b2   : > { %4920 = vmatpush3.msra.mxu1 %v1885_v25 }
 0x4b3   : > { %4867 = vmatmul.mubr.f32.gmra.mxu1 %v5731_v41  ;;  %4921 = vmatprep.subr.mxu1 %v4899_v22  ;;  %v6019_v41 = vld [vmem:[%s5982_s18 + $0x30] sm:$0xff] }
 0x4b4   : > { %4922 = vmatpush3.msra.mxu1 %v4899_v22  ;;  %4869 = vmatprep.mubr.f32.mxu1 %v5734_v42  ;;  %v6024_v42 = vld [vmem:[%s5982_s18 + $0x38] sm:$0xff] }
 0x4b5   : > { %4923 = vmatprep.subr.mxu1 %v1875_v23 }
 0x4b6   : > { %4924 = vmatpush3.msra.mxu1 %v1875_v23 }
 0x4b7   : > { %4870 = vmatmul.mubr.f32.gmra.mxu1 %v5739_v43  ;;  %4925 = vmatprep.subr.mxu1 %v4896_v20  ;;  %v6027_v43 = vld [vmem:[%s5982_s18 + $0x40] sm:$0xff] }
 0x4b8   : > { %4926 = vmatpush3.msra.mxu1 %v4896_v20  ;;  %4872 = vmatprep.mubr.f32.mxu1 %v5742_v44  ;;  %v6032_v44 = vld [vmem:[%s5982_s18 + $0x48] sm:$0xff] }
 0x4b9   : > { %4927 = vmatprep.subr.mxu1 %v1865_v21 }
 0x4ba   : > { %4928 = vmatpush3.msra.mxu1 %v1865_v21 }
 0x4bb   : > { %4873 = vmatmul.mubr.f32.gmra.mxu1 %v5747_v45  ;;  %4929 = vmatprep.subr.mxu1 %v5958_v16  ;;  %v6035_v45 = vld [vmem:[%s5982_s18 + $0x50] sm:$0xff] }
 0x4bc   : > { %4930 = vmatpush3.msra.mxu1 %v5958_v16  ;;  %4875 = vmatprep.mubr.f32.mxu1 %v5750_v46  ;;  %v6040_v46 = vld [vmem:[%s5982_s18 + $0x58] sm:$0xff] }
 0x4bd   : > { %4931 = vmatprep.subr.mxu1 %v5960_v17 }
 0x4be   : > { %4932 = vmatpush3.msra.mxu1 %v5960_v17 }
 0x4bf   : > { %4876 = vmatmul.mubr.f32.gmra.mxu1 %v5755_v47  ;;  %4933 = vmatprep.subr.mxu1 %v5954_v14  ;;  %v6043_v47 = vld [vmem:[%s5982_s18 + $0x60] sm:$0xff] }
 0x4c0   : > { %4934 = vmatpush3.msra.mxu1 %v5954_v14  ;;  %4878 = vmatprep.mubr.f32.mxu1 %v5758_v48  ;;  %v6048_v48 = vld [vmem:[%s5982_s18 + $0x68] sm:$0xff] }
 0x4c1   : > { %4935 = vmatprep.subr.mxu1 %v5956_v15 }
 0x4c2   : > { %4936 = vmatpush3.msra.mxu1 %v5956_v15 }
 0x4c3   : > { %4879 = vmatmul.mubr.f32.gmra.mxu1 %v5763_v49  ;;  %4937 = vmatprep.subr.mxu1 %v5950_v12  ;;  %v6051_v49 = vld [vmem:[%s5982_s18 + $0x70] sm:$0xff] }
 0x4c4   : > { %4938 = vmatpush3.msra.mxu1 %v5950_v12  ;;  %4941 = vmatprep.mubr.f32.mxu1 %v5990_v35 }
 0x4c5   : > { %4939 = vmatprep.subr.mxu1 %v5952_v13 }
 0x4c6   : > { %4940 = vmatpush3.msra.mxu1 %v5952_v13 }
 0x4c7   : > { %4942 = vmatmul.mubr.f32.vlgmr.msra.gmra.mxu1 %v5998_v36 }
 0x4c8   : > { %4944 = vmatprep.mubr.f32.mxu1 %v6002_v37 }
 0x4cb   : > { %4945 = vmatmul.mubr.f32.gmra.mxu1 %v6008_v38 }
 0x4cc   : > { %4947 = vmatprep.mubr.f32.mxu1 %v6011_v39 }
 0x4cf   : > { %4948 = vmatmul.mubr.f32.gmra.mxu1 %v6016_v40 }
 0x4d0   : > { %4950 = vmatprep.mubr.f32.mxu1 %v6019_v41 }
 0x4d3   : > { %4951 = vmatmul.mubr.f32.gmra.mxu1 %v6024_v42 }
 0x4d4   : > { %4953 = vmatprep.mubr.f32.mxu1 %v6027_v43 }
 0x4d7   : > { %4954 = vmatmul.mubr.f32.gmra.mxu1 %v6032_v44 }
 0x4d8   : > { %4956 = vmatprep.mubr.f32.mxu1 %v6035_v45 }
 0x4db   : > { %4957 = vmatmul.mubr.f32.gmra.mxu1 %v6040_v46 }
 0x4dc   : > { %4959 = vmatprep.mubr.f32.mxu1 %v6043_v47 }
 0x4df   : > { %4960 = vmatmul.mubr.f32.gmra.mxu1 %v6048_v48 }
 0x4e0   : > { %4962 = vmatprep.mubr.f32.mxu1 %v6051_v49 }
 0x4e3   : > { %4963 = vmatmul.mubr.f32.gmra.mxu1 %v6056_v18 }
 0x4e4   : > { %5029 = vmatprep.mubr.f32.mxu1 %v5990_v35 }
 0x567   : > { %v6060_v30 = vpop.f32.mrf.mxu1 }
 0x569   : > { %v6062_v31 = vpop.f32.mrf.mxu1 }
 0x56b   : > { %v6064_v50 = vpop.f32.mrf.mxu1 }
 0x56d   : > { %v6066_v51 = vpop.f32.mrf.mxu1 }
 0x56f   : > { %v6068_v32 = vpop.f32.mrf.mxu1 }
 0x571   : > { %v6070_v52 = vpop.f32.mrf.mxu1 }
 0x573   : > { %v6072_v33 = vpop.f32.mrf.mxu1 }
 0x575   : > { %v6074_v53 = vpop.f32.mrf.mxu1 }
 0x577   : > { %v6076_v34 = vpop.f32.mrf.mxu1 }
 0x579   : > { %v6078_v55 = vpop.f32.mrf.mxu1 }
 0x57b   : > { %v6080_v56 = vpop.f32.mrf.mxu1 }
 0x57d   : > { %v6082_v57 = vpop.f32.mrf.mxu1 }
 0x57f   : > { %v6084_v0 = vpop.f32.mrf.mxu1 }
 0x581   : > { %v6086_v58 = vpop.f32.mrf.mxu1 }
 0x583   : > { %v4880_v59 = vpop.f32.mrf.mxu1 }
 0x584   : > { %v6103_v13 = vadd.f32 %v4880_v59, %v6099_v11 }
 0x585   : > { %v6088_v60 = vpop.f32.mrf.mxu1 }
 0x587   : > { %v4943_v61 = vpop.f32.mrf.mxu1 }
 0x588   : > { %v1986_v2 = vadd.f32 %v4943_v61, %v5798_v54 }
 0x589   : > { %v1980_v1 = vpop.f32.mrf.mxu1 }
 0x58a   : > { %v1981_v3 = vadd.f32 %v5798_v54, %v1980_v1  ;;  %v2060_v6 = vmax.f32 %v1986_v2, 0.0 }
 0x58b   : > { %v4946_v4 = vpop.f32.mrf.mxu1 }
 0x58c   : > { %v2059_v5 = vmax.f32 %v1981_v3, 0.0  ;;  %v1996_v7 = vadd.f32 %v4946_v4, %v5798_v54 }
 0x58d   : > { %v1990_v8 = vpop.f32.mrf.mxu1 }
 0x58e   : > { %v1991_v9 = vadd.f32 %v5798_v54, %v1990_v8  ;;  %4973 = vmatprep.mubr.msk.f32.mxu0 %vm984_vm1, %v2059_v5  ;;  %v2062_v14 = vmax.f32 %v1996_v7, 0.0 }
 0x58f   : > { %v4949_v10 = vpop.f32.mrf.mxu1  ;;  %4974 = vmatmul.mubr.msk.f32.vlgmr.msra.gmra.mxu0 %vm984_vm1, %v2060_v6 }
 0x590   : > { %v2061_v12 = vmax.f32 %v1991_v9, 0.0  ;;  %5054 = vmatpush3.msra.mxu0 %v5835_v62  ;;  %v2006_v15 = vadd.f32 %v4949_v10, %v5798_v54 }
 0x591   : > { %5055 = vmatprep.subr.mxu0 %v5840_v63  ;;  %v2000_v16 = vpop.f32.mrf.mxu1 }
 0x592   : > { %v2001_v17 = vadd.f32 %v5798_v54, %v2000_v16  ;;  %5056 = vmatpush3.msra.mxu0 %v5840_v63  ;;  %4976 = vmatprep.mubr.msk.f32.mxu0 %vm984_vm1, %v2061_v12  ;;  %v2064_v21 = vmax.f32 %v2006_v15, 0.0 }
 0x593   : > { %5137 = vmatprep.subr.mxu0 %v6103_v13  ;;  %v4952_v20 = vpop.f32.mrf.mxu1  ;;  %4977 = vmatmul.mubr.msk.f32.gmra.mxu0 %vm984_vm1, %v2062_v14 }
 0x594   : > { %v2063_v62 = vmax.f32 %v2001_v17, 0.0  ;;  %v2016_v22 = vadd.f32 %v4952_v20, %v5798_v54 }
 0x595   : > { %v2010_v23 = vpop.f32.mrf.mxu1 }
 0x596   : > { %v2011_v24 = vadd.f32 %v5798_v54, %v2010_v23  ;;  %4979 = vmatprep.mubr.msk.f32.mxu0 %vm984_vm1, %v2063_v62  ;;  %v2066_v26 = vmax.f32 %v2016_v22, 0.0 }
 0x597   : > { %v4955_v25 = vpop.f32.mrf.mxu1  ;;  %4980 = vmatmul.mubr.msk.f32.gmra.mxu0 %vm984_vm1, %v2064_v21 }
 0x598   : > { %v2065_v63 = vmax.f32 %v2011_v24, 0.0  ;;  %v2026_v27 = vadd.f32 %v4955_v25, %v5798_v54 }
 0x599   : > { %v2020_v28 = vpop.f32.mrf.mxu1 }
 0x59a   : > { %v2021_v29 = vadd.f32 %v5798_v54, %v2020_v28  ;;  %4982 = vmatprep.mubr.msk.f32.mxu0 %vm984_vm1, %v2065_v63  ;;  %v2068_v2 = vmax.f32 %v2026_v27, 0.0 }
 0x59b   : > { %v4958_v59 = vpop.f32.mrf.mxu1  ;;  %4983 = vmatmul.mubr.msk.f32.gmra.mxu0 %vm984_vm1, %v2066_v26 }
 0x59c   : > { %v2067_v61 = vmax.f32 %v2021_v29, 0.0  ;;  %v2036_v1 = vadd.f32 %v4958_v59, %v5798_v54 }
 0x59d   : > { %v2030_v3 = vpop.f32.mrf.mxu1 }
 0x59e   : > { %v2031_v4 = vadd.f32 %v5798_v54, %v2030_v3  ;;  %4985 = vmatprep.mubr.msk.f32.mxu0 %vm984_vm1, %v2067_v61  ;;  %v2070_v7 = vmax.f32 %v2036_v1, 0.0 }
 0x59f   : > { %v4961_v5 = vpop.f32.mrf.mxu1  ;;  %4986 = vmatmul.mubr.msk.f32.gmra.mxu0 %vm984_vm1, %v2068_v2 }
 0x5a0   : > { %v2069_v6 = vmax.f32 %v2031_v4, 0.0  ;;  %v2046_v8 = vadd.f32 %v4961_v5, %v5798_v54 }
 0x5a1   : > { %v2040_v9 = vpop.f32.mrf.mxu1 }
 0x5a2   : > { %v2041_v10 = vadd.f32 %v5798_v54, %v2040_v9  ;;  %4988 = vmatprep.mubr.msk.f32.mxu0 %vm984_vm1, %v2069_v6  ;;  %v2072_v15 = vmax.f32 %v2046_v8, 0.0 }
 0x5a3   : > { %v4964_v12 = vpop.f32.mrf.mxu1  ;;  %4989 = vmatmul.mubr.msk.f32.gmra.mxu0 %vm984_vm1, %v2070_v7 }
 0x5a4   : > { %v2071_v14 = vmax.f32 %v2041_v10, 0.0  ;;  %v2056_v16 = vadd.f32 %v4964_v12, %v5798_v54 }
 0x5a5   : > { %v2050_v17 = vpop.f32.mrf.mxu1 }
 0x5a6   : > { %v2051_v20 = vadd.f32 %v5798_v54, %v2050_v17  ;;  %4991 = vmatprep.mubr.msk.f32.mxu0 %vm984_vm1, %v2071_v14  ;;  %v2074_v21 = vmax.f32 %v2056_v16, 0.0  ;;  %v6157_v17 = vadd.f32 %v6099_v11, %v6088_v60  ;;  %v6172_v60 = vadd.f32 %v6099_v11, %v6086_v58 }
 0x5a7   : > { %4992 = vmatmul.mubr.msk.f32.gmra.mxu0 %vm984_vm1, %v2072_v15 }
 0x5a8   : > { %v2073_v62 = vmax.f32 %v2051_v20, 0.0 }
 0x5aa   : > { %4994 = vmatprep.mubr.msk.f32.mxu0 %vm984_vm1, %v2073_v62  ;;  %v6163_v62 = vadd.f32 %v6084_v0, %v6099_v11 }
 0x5ab   : > { %4995 = vmatmul.mubr.msk.f32.gmra.mxu0 %vm984_vm1, %v2074_v21 }
 0x64f   : > { %v4975_v22 = vpop.f32.mrf.mxu0 }
 0x651   : > { %v2189_v23 = vpop.f32.mrf.mxu0 }
 0x653   : > { %v4978_v24 = vpop.f32.mrf.mxu0 }
 0x655   : > { %v2199_v25 = vpop.f32.mrf.mxu0 }
 0x657   : > { %v4981_v63 = vpop.f32.mrf.mxu0 }
 0x659   : > { %v2209_v26 = vpop.f32.mrf.mxu0 }
 0x65b   : > { %v4984_v27 = vpop.f32.mrf.mxu0 }
 0x65d   : > { %v2219_v28 = vpop.f32.mrf.mxu0 }
 0x65f   : > { %v4987_v29 = vpop.f32.mrf.mxu0 }
 0x661   : > { %v2229_v54 = vpop.f32.mrf.mxu0 }
 0x663   : > { %v4990_v59 = vpop.f32.mrf.mxu0 }
 0x665   : > { %v2239_v61 = vpop.f32.mrf.mxu0 }
 0x667   : > { %v4993_v2 = vpop.f32.mrf.mxu0 }
 0x669   : > { %v2249_v1 = vpop.f32.mrf.mxu0 }
 0x66b   : > { %v4996_v3 = vpop.f32.mrf.mxu0 }
 0x66c   : > { %4997 = vmatprep.subr.mxu1 %v4996_v3 }
 0x66d   : > { %v2259_v4 = vpop.f32.mrf.mxu0  ;;  %4998 = vmatpush3.msra.mxu1 %v4996_v3  ;;  %v6204_v3 = vadd.f32 %v6099_v11, %v6078_v55 }
 0x66e   : > { %4999 = vmatprep.subr.mxu1 %v2259_v4 }
 0x66f   : > { %5000 = vmatpush3.msra.mxu1 %v2259_v4 }
 0x670   : > { %5001 = vmatprep.subr.mxu1 %v4993_v2 }
 0x671   : > { %5002 = vmatpush3.msra.mxu1 %v4993_v2 }
 0x672   : > { %5003 = vmatprep.subr.mxu1 %v2249_v1 }
 0x673   : > { %5004 = vmatpush3.msra.mxu1 %v2249_v1 }
 0x674   : > { %5005 = vmatprep.subr.mxu1 %v4990_v59 }
 0x675   : > { %5006 = vmatpush3.msra.mxu1 %v4990_v59  ;;  %v6195_v59 = vadd.f32 %v6076_v34, %v6099_v11 }
 0x676   : > { %5007 = vmatprep.subr.mxu1 %v2239_v61 }
 0x677   : > { %5008 = vmatpush3.msra.mxu1 %v2239_v61 }
 0x678   : > { %5009 = vmatprep.subr.mxu1 %v4987_v29 }
 0x679   : > { %5010 = vmatpush3.msra.mxu1 %v4987_v29  ;;  %v6188_v29 = vadd.f32 %v6099_v11, %v6082_v57 }
 0x67a   : > { %5011 = vmatprep.subr.mxu1 %v2229_v54 }
 0x67b   : > { %5012 = vmatpush3.msra.mxu1 %v2229_v54 }
 0x67c   : > { %5013 = vmatprep.subr.mxu1 %v4984_v27 }
 0x67d   : > { %5014 = vmatpush3.msra.mxu1 %v4984_v27 }
 0x67e   : > { %5015 = vmatprep.subr.mxu1 %v2219_v28 }
 0x67f   : > { %5016 = vmatpush3.msra.mxu1 %v2219_v28 }
 0x680   : > { %5017 = vmatprep.subr.mxu1 %v4981_v63 }
 0x681   : > { %5018 = vmatpush3.msra.mxu1 %v4981_v63  ;;  %v6179_v63 = vadd.f32 %v6080_v56, %v6099_v11 }
 0x682   : > { %5019 = vmatprep.subr.mxu1 %v2209_v26 }
 0x683   : > { %5020 = vmatpush3.msra.mxu1 %v2209_v26 }
 0x684   : > { %5021 = vmatprep.subr.mxu1 %v4978_v24 }
 0x685   : > { %5022 = vmatpush3.msra.mxu1 %v4978_v24 }
 0x686   : > { %5023 = vmatprep.subr.mxu1 %v2199_v25 }
 0x687   : > { %5024 = vmatpush3.msra.mxu1 %v2199_v25 }
 0x688   : > { %5025 = vmatprep.subr.mxu1 %v4975_v22 }
 0x689   : > { %5026 = vmatpush3.msra.mxu1 %v4975_v22 }
 0x68a   : > { %5027 = vmatprep.subr.mxu1 %v2189_v23 }
 0x68b   : > { %5028 = vmatpush3.msra.mxu1 %v2189_v23 }
 0x68c   : > { %5030 = vmatmul.mubr.f32.vlgmr.msra.gmra.mxu1 %v5998_v36 }
 0x68d   : > { %5032 = vmatprep.mubr.f32.mxu1 %v6002_v37 }
 0x690   : > { %5033 = vmatmul.mubr.f32.gmra.mxu1 %v6008_v38 }
 0x691   : > { %5035 = vmatprep.mubr.f32.mxu1 %v6011_v39 }
 0x694   : > { %5036 = vmatmul.mubr.f32.gmra.mxu1 %v6016_v40 }
 0x695   : > { %5038 = vmatprep.mubr.f32.mxu1 %v6019_v41 }
 0x698   : > { %5039 = vmatmul.mubr.f32.gmra.mxu1 %v6024_v42 }
 0x699   : > { %5041 = vmatprep.mubr.f32.mxu1 %v6027_v43 }
 0x69c   : > { %5042 = vmatmul.mubr.f32.gmra.mxu1 %v6032_v44 }
 0x69d   : > { %5044 = vmatprep.mubr.f32.mxu1 %v6035_v45 }
 0x6a0   : > { %5045 = vmatmul.mubr.f32.gmra.mxu1 %v6040_v46 }
 0x6a1   : > { %5047 = vmatprep.mubr.f32.mxu1 %v6043_v47 }
 0x6a4   : > { %5048 = vmatmul.mubr.f32.gmra.mxu1 %v6048_v48 }
 0x6a5   : > { %5050 = vmatprep.mubr.f32.mxu1 %v6051_v49 }
 0x6a8   : > { %5051 = vmatmul.mubr.f32.gmra.mxu1 %v6056_v18 }
 0x6a9   : > { %5113 = vmatprep.mubr.f32.mxu1 %v5990_v35 }
 0x74c   : > { %v5031_v5 = vpop.f32.mrf.mxu1 }
 0x74d   : > { %v2340_v6 = vadd.f32 %v5031_v5, %v5866_v19  ;;  %v6211_v5 = vadd.f32 %v6072_v33, %v6099_v11 }
 0x74e   : > { %v2334_v7 = vpop.f32.mrf.mxu1 }
 0x74f   : > { %v2335_v8 = vadd.f32 %v5866_v19, %v2334_v7  ;;  %v2414_v12 = vmax.f32 %v2340_v6, 0.0 }
 0x750   : > { %v5034_v9 = vpop.f32.mrf.mxu1 }
 0x751   : > { %v2413_v10 = vmax.f32 %v2335_v8, 0.0  ;;  %v2350_v14 = vadd.f32 %v5034_v9, %v5866_v19  ;;  %v6220_v9 = vadd.f32 %v6099_v11, %v6074_v53 }
 0x752   : > { %v2344_v15 = vpop.f32.mrf.mxu1 }
 0x753   : > { %v2345_v16 = vadd.f32 %v5866_v19, %v2344_v15  ;;  %5057 = vmatprep.mubr.msk.f32.mxu0 %vm623_vm0, %v2413_v10  ;;  %v2416_v21 = vmax.f32 %v2350_v14, 0.0 }
 0x754   : > { %v5037_v35 = vpop.f32.mrf.mxu1  ;;  %5058 = vmatmul.mubr.msk.f32.vlgmr.msra.gmra.mxu0 %vm623_vm0, %v2414_v12  ;;  %v6227_v12 = vadd.f32 %v6068_v32, %v6099_v11 }
 0x755   : > { %v2415_v20 = vmax.f32 %v2345_v16, 0.0  ;;  %5138 = vmatpush3.msra.mxu0 %v6103_v13  ;;  %v2360_v22 = vadd.f32 %v5037_v35, %v5866_v19  ;;  %v6236_v35 = vadd.f32 %v6099_v11, %v6070_v52 }
 0x756   : > { %5139 = vmatprep.subr.mxu0 %v6157_v17  ;;  %v2354_v23 = vpop.f32.mrf.mxu1 }
 0x757   : > { %v2355_v24 = vadd.f32 %v5866_v19, %v2354_v23  ;;  %5140 = vmatpush3.msra.mxu0 %v6157_v17  ;;  %5060 = vmatprep.mubr.msk.f32.mxu0 %vm623_vm0, %v2415_v20  ;;  %v2418_v26 = vmax.f32 %v2360_v22, 0.0 }
 0x758   : > { %5141 = vmatprep.subr.mxu0 %v6163_v62  ;;  %v5040_v0 = vpop.f32.mrf.mxu1  ;;  %5061 = vmatmul.mubr.msk.f32.gmra.mxu0 %vm623_vm0, %v2416_v21  ;;  %v6243_v21 = vadd.f32 %v6064_v50, %v6099_v11 }
 0x759   : > { %v2417_v25 = vmax.f32 %v2355_v24, 0.0  ;;  %5142 = vmatpush3.msra.mxu0 %v6163_v62  ;;  %v2370_v27 = vadd.f32 %v5040_v0, %v5866_v19  ;;  %v6252_v0 = vadd.f32 %v6099_v11, %v6066_v51  ;;  %v6266_v51 = vadd.f32 %v6099_v11, %v6062_v31 }
 0x75a   : > { %5143 = vmatprep.subr.mxu0 %v6172_v60  ;;  %v2364_v28 = vpop.f32.mrf.mxu1 }
 0x75b   : > { %v2365_v58 = vadd.f32 %v5866_v19, %v2364_v28  ;;  %5144 = vmatpush3.msra.mxu0 %v6172_v60  ;;  %5063 = vmatprep.mubr.msk.f32.mxu0 %vm623_vm0, %v2417_v25  ;;  %v2420_v61 = vmax.f32 %v2370_v27, 0.0  ;;  %v6259_v25 = vadd.f32 %v6060_v30, %v6099_v11  ;;  %v2767_v30 = vld [vmem:[%s6694_s12] sm:$0xff] }
 0x75c   : > { %5145 = vmatprep.subr.mxu0 %v6179_v63  ;;  %v5043_v56 = vpop.f32.mrf.mxu1  ;;  %5064 = vmatmul.mubr.msk.f32.gmra.mxu0 %vm623_vm0, %v2418_v26  ;;  %v2768_v26 = vld [vmem:[%s6694_s12 + $0x8] sm:$0xff] }
 0x75d   : > { %v2419_v54 = vmax.f32 %v2365_v58, 0.0  ;;  %5146 = vmatpush3.msra.mxu0 %v6179_v63  ;;  %v2380_v2 = vadd.f32 %v5043_v56, %v5866_v19 }
 0x75e   : > { %5147 = vmatprep.subr.mxu0 %v6188_v29  ;;  %v2374_v1 = vpop.f32.mrf.mxu1 }
 0x75f   : > { %v2375_v57 = vadd.f32 %v5866_v19, %v2374_v1  ;;  %5148 = vmatpush3.msra.mxu0 %v6188_v29  ;;  %5066 = vmatprep.mubr.msk.f32.mxu0 %vm623_vm0, %v2419_v54  ;;  %v2422_v6 = vmax.f32 %v2380_v2, 0.0 }
 0x760   : > { %5149 = vmatprep.subr.mxu0 %v6195_v59  ;;  %v5046_v34 = vpop.f32.mrf.mxu1  ;;  %5067 = vmatmul.mubr.msk.f32.gmra.mxu0 %vm623_vm0, %v2420_v61 }
 0x761   : > { %v2421_v4 = vmax.f32 %v2375_v57, 0.0  ;;  %5150 = vmatpush3.msra.mxu0 %v6195_v59  ;;  %v2390_v7 = vadd.f32 %v5046_v34, %v5866_v19 }
 0x762   : > { %5151 = vmatprep.subr.mxu0 %v6204_v3  ;;  %v2384_v8 = vpop.f32.mrf.mxu1 }
 0x763   : > { %v2385_v55 = vadd.f32 %v5866_v19, %v2384_v8  ;;  %5152 = vmatpush3.msra.mxu0 %v6204_v3  ;;  %5069 = vmatprep.mubr.msk.f32.mxu0 %vm623_vm0, %v2421_v4  ;;  %v2424_v14 = vmax.f32 %v2390_v7, 0.0 }
 0x764   : > { %5153 = vmatprep.subr.mxu0 %v6211_v5  ;;  %v5049_v33 = vpop.f32.mrf.mxu1  ;;  %5070 = vmatmul.mubr.msk.f32.gmra.mxu0 %vm623_vm0, %v2422_v6 }
 0x765   : > { %v2423_v10 = vmax.f32 %v2385_v55, 0.0  ;;  %5154 = vmatpush3.msra.mxu0 %v6211_v5  ;;  %v2400_v15 = vadd.f32 %v5049_v33, %v5866_v19 }
 0x766   : > { %5155 = vmatprep.subr.mxu0 %v6220_v9  ;;  %v2394_v16 = vpop.f32.mrf.mxu1 }
 0x767   : > { %v2395_v53 = vadd.f32 %v5866_v19, %v2394_v16  ;;  %5156 = vmatpush3.msra.mxu0 %v6220_v9  ;;  %5072 = vmatprep.mubr.msk.f32.mxu0 %vm623_vm0, %v2423_v10  ;;  %v2426_v22 = vmax.f32 %v2400_v15, 0.0 }
 0x768   : > { %5157 = vmatprep.subr.mxu0 %v6227_v12  ;;  %v5052_v32 = vpop.f32.mrf.mxu1  ;;  %5073 = vmatmul.mubr.msk.f32.gmra.mxu0 %vm623_vm0, %v2424_v14 }
 0x769   : > { %v2425_v20 = vmax.f32 %v2395_v53, 0.0  ;;  %5158 = vmatpush3.msra.mxu0 %v6227_v12  ;;  %v2410_v23 = vadd.f32 %v5052_v32, %v5866_v19 }
 0x76a   : > { %5159 = vmatprep.subr.mxu0 %v6236_v35  ;;  %v2404_v24 = vpop.f32.mrf.mxu1 }
 0x76b   : > { %v2405_v52 = vadd.f32 %v5866_v19, %v2404_v24  ;;  %5160 = vmatpush3.msra.mxu0 %v6236_v35  ;;  %5075 = vmatprep.mubr.msk.f32.mxu0 %vm623_vm0, %v2425_v20  ;;  %v2428_v19 = vmax.f32 %v2410_v23, 0.0 }
 0x76c   : > { %5161 = vmatprep.subr.mxu0 %v6243_v21  ;;  %5076 = vmatmul.mubr.msk.f32.gmra.mxu0 %vm623_vm0, %v2426_v22 }
 0x76d   : > { %v2427_v50 = vmax.f32 %v2405_v52, 0.0  ;;  %5162 = vmatpush3.msra.mxu0 %v6243_v21 }
 0x76e   : > { %5163 = vmatprep.subr.mxu0 %v6252_v0 }
 0x76f   : > { %5164 = vmatpush3.msra.mxu0 %v6252_v0  ;;  %5078 = vmatprep.mubr.msk.f32.mxu0 %vm623_vm0, %v2427_v50 }
 0x770   : > { %5165 = vmatprep.subr.mxu0 %v6259_v25  ;;  %5079 = vmatmul.mubr.msk.f32.gmra.mxu0 %vm623_vm0, %v2428_v19 }
 0x771   : > { %5166 = vmatpush3.msra.mxu0 %v6259_v25  ;;  %5169 = vmatprep.mubr.f32.mxu0 %v2767_v30 }
 0x772   : > { %5167 = vmatprep.subr.mxu0 %v6266_v51 }
 0x773   : > { %5168 = vmatpush3.msra.mxu0 %v6266_v51 }
 0x774   : > { %5170 = vmatmul.mubr.f32.vlgmr.msra.gmra.mxu0 %v2768_v26 }
 0x814   : > { %v5059_v31 = vpop.f32.mrf.mxu0 }
 0x816   : > { %v2543_v27 = vpop.f32.mrf.mxu0 }
 0x818   : > { %v5062_v28 = vpop.f32.mrf.mxu0 }
 0x81a   : > { %v2553_v58 = vpop.f32.mrf.mxu0 }
 0x81c   : > { %v5065_v56 = vpop.f32.mrf.mxu0 }
 0x81e   : > { %v2563_v54 = vpop.f32.mrf.mxu0 }
 0x820   : > { %v5068_v61 = vpop.f32.mrf.mxu0 }
 0x822   : > { %v2573_v2 = vpop.f32.mrf.mxu0 }
 0x824   : > { %v5071_v1 = vpop.f32.mrf.mxu0 }
 0x826   : > { %v2583_v57 = vpop.f32.mrf.mxu0 }
 0x828   : > { %v5074_v34 = vpop.f32.mrf.mxu0 }
 0x82a   : > { %v2593_v4 = vpop.f32.mrf.mxu0 }
 0x82c   : > { %v5077_v6 = vpop.f32.mrf.mxu0 }
 0x82e   : > { %v2603_v7 = vpop.f32.mrf.mxu0 }
 0x830   : > { %v5080_v8 = vpop.f32.mrf.mxu0 }
 0x831   : > { %5081 = vmatprep.subr.mxu1 %v5080_v8 }
 0x832   : > { %v2613_v55 = vpop.f32.mrf.mxu0  ;;  %5082 = vmatpush3.msra.mxu1 %v5080_v8  ;;  %v3317_v8 = vld [vmem:[%s6697_s15 + $0x10] sm:$0xff] }
 0x833   : > { %5083 = vmatprep.subr.mxu1 %v2613_v55 }
 0x834   : > { %5084 = vmatpush3.msra.mxu1 %v2613_v55  ;;  %v3318_v55 = vld [vmem:[%s6697_s15 + $0x18] sm:$0xff] }
 0x835   : > { %5085 = vmatprep.subr.mxu1 %v5077_v6 }
 0x836   : > { %5086 = vmatpush3.msra.mxu1 %v5077_v6 }
 0x837   : > { %5087 = vmatprep.subr.mxu1 %v2603_v7 }
 0x838   : > { %5088 = vmatpush3.msra.mxu1 %v2603_v7  ;;  %v3316_v7 = vld [vmem:[%s6697_s15 + $0x8] sm:$0xff] }
 0x839   : > { %5089 = vmatprep.subr.mxu1 %v5074_v34 }
 0x83a   : > { %5090 = vmatpush3.msra.mxu1 %v5074_v34 }
 0x83b   : > { %5091 = vmatprep.subr.mxu1 %v2593_v4 }
 0x83c   : > { %5092 = vmatpush3.msra.mxu1 %v2593_v4 }
 0x83d   : > { %5093 = vmatprep.subr.mxu1 %v5071_v1 }
 0x83e   : > { %5094 = vmatpush3.msra.mxu1 %v5071_v1 }
 0x83f   : > { %5095 = vmatprep.subr.mxu1 %v2583_v57 }
 0x840   : > { %5096 = vmatpush3.msra.mxu1 %v2583_v57 }
 0x841   : > { %5097 = vmatprep.subr.mxu1 %v5068_v61 }
 0x842   : > { %5098 = vmatpush3.msra.mxu1 %v5068_v61  ;;  %v3315_v61 = vld [vmem:[%s6697_s15] sm:$0xff] }
 0x843   : > { %5099 = vmatprep.subr.mxu1 %v2573_v2 }
 0x844   : > { %5100 = vmatpush3.msra.mxu1 %v2573_v2 }
 0x845   : > { %5101 = vmatprep.subr.mxu1 %v5065_v56 }
 0x846   : > { %5102 = vmatpush3.msra.mxu1 %v5065_v56  ;;  %v2921_v56 = vld [vmem:[%s6692_s10] sm:$0xff] }
 0x847   : > { %5103 = vmatprep.subr.mxu1 %v2563_v54 }
 0x848   : > { %5104 = vmatpush3.msra.mxu1 %v2563_v54 }
 0x849   : > { %5105 = vmatprep.subr.mxu1 %v5062_v28 }
 0x84a   : > { %5106 = vmatpush3.msra.mxu1 %v5062_v28 }
 0x84b   : > { %5107 = vmatprep.subr.mxu1 %v2553_v58 }
 0x84c   : > { %5108 = vmatpush3.msra.mxu1 %v2553_v58  ;;  %v2845_v58 = vld [vmem:[%s6695_s13 + $0x8] sm:$0xff] }
 0x84d   : > { %5109 = vmatprep.subr.mxu1 %v5059_v31 }
 0x84e   : > { %5110 = vmatpush3.msra.mxu1 %v5059_v31 }
 0x84f   : > { %5111 = vmatprep.subr.mxu1 %v2543_v27 }
 0x850   : > { %5112 = vmatpush3.msra.mxu1 %v2543_v27  ;;  %v5171_v27 = vpop.f32.mrf.mxu0 }
 0x851   : > { %5114 = vmatmul.mubr.f32.vlgmr.msra.gmra.mxu1 %v5998_v36  ;;  %v2844_v36 = vld [vmem:[%s6695_s13] sm:$0xff] }
 0x852   : > { %5116 = vmatprep.mubr.f32.mxu1 %v6002_v37  ;;  %v2835_v54 = vpop.f32.mrf.mxu0 }
 0x855   : > { %5117 = vmatmul.mubr.f32.gmra.mxu1 %v6008_v38 }
 0x856   : > { %5119 = vmatprep.mubr.f32.mxu1 %v6011_v39 }
 0x859   : > { %5120 = vmatmul.mubr.f32.gmra.mxu1 %v6016_v40 }
 0x85a   : > { %5122 = vmatprep.mubr.f32.mxu1 %v6019_v41 }
 0x85d   : > { %5123 = vmatmul.mubr.f32.gmra.mxu1 %v6024_v42 }
 0x85e   : > { %5125 = vmatprep.mubr.f32.mxu1 %v6027_v43 }
 0x861   : > { %5126 = vmatmul.mubr.f32.gmra.mxu1 %v6032_v44 }
 0x862   : > { %5128 = vmatprep.mubr.f32.mxu1 %v6035_v45 }
 0x865   : > { %5129 = vmatmul.mubr.f32.gmra.mxu1 %v6040_v46 }
 0x866   : > { %5131 = vmatprep.mubr.f32.mxu1 %v6043_v47 }
 0x869   : > { %5132 = vmatmul.mubr.f32.gmra.mxu1 %v6048_v48 }
 0x86a   : > { %5134 = vmatprep.mubr.f32.mxu1 %v6051_v49 }
 0x86d   : > { %5135 = vmatmul.mubr.f32.gmra.mxu1 %v6056_v18 }
 0x86e   : > { %5204 = vmatprep.mubr.f32.mxu1 %v2844_v36  ;;  %v3319_v36 = vld [vmem:[%s6697_s15 + $0x20] sm:$0xff] }
 0x911   : > { %v5115_v37 = vpop.f32.mrf.mxu1 }
 0x912   : > { %v6366_v31 = vadd.f32 %v5115_v37, %v6099_v11  ;;  %v3320_v37 = vld [vmem:[%s6697_s15 + $0x28] sm:$0xff] }
 0x913   : > { %v2688_v38 = vpop.f32.mrf.mxu1 }
 0x914   : > { %v6371_v28 = vadd.f32 %v6099_v11, %v2688_v38  ;;  %v3321_v38 = vld [vmem:[%s6697_s15 + $0x30] sm:$0xff] }
 0x915   : > { %v5118_v39 = vpop.f32.mrf.mxu1 }
 0x916   : > { %v6356_v30 = vadd.f32 %v5118_v39, %v6099_v11  ;;  %v3322_v39 = vld [vmem:[%s6697_s15 + $0x38] sm:$0xff] }
 0x917   : > { %v2698_v40 = vpop.f32.mrf.mxu1 }
 0x918   : > { %v6361_v26 = vadd.f32 %v6099_v11, %v2698_v40  ;;  %v3323_v40 = vld [vmem:[%s6697_s15 + $0x40] sm:$0xff] }
 0x919   : > { %v5121_v41 = vpop.f32.mrf.mxu1 }
 0x91a   : > { %v6346_v50 = vadd.f32 %v5121_v41, %v6099_v11  ;;  %v3324_v41 = vld [vmem:[%s6697_s15 + $0x48] sm:$0xff] }
 0x91b   : > { %v2708_v42 = vpop.f32.mrf.mxu1 }
 0x91c   : > { %v6351_v19 = vadd.f32 %v6099_v11, %v2708_v42  ;;  %v3325_v42 = vld [vmem:[%s6697_s15 + $0x50] sm:$0xff] }
 0x91d   : > { %v5124_v43 = vpop.f32.mrf.mxu1 }
 0x91e   : > { %v6336_v24 = vadd.f32 %v5124_v43, %v6099_v11  ;;  %v3326_v43 = vld [vmem:[%s6697_s15 + $0x58] sm:$0xff] }
 0x91f   : > { %v2718_v44 = vpop.f32.mrf.mxu1 }
 0x920   : > { %v6341_v52 = vadd.f32 %v6099_v11, %v2718_v44  ;;  %v3327_v44 = vld [vmem:[%s6697_s15 + $0x60] sm:$0xff] }
 0x921   : > { %v5127_v45 = vpop.f32.mrf.mxu1 }
 0x922   : > { %v6326_v22 = vadd.f32 %v5127_v45, %v6099_v11  ;;  %v3328_v45 = vld [vmem:[%s6697_s15 + $0x68] sm:$0xff] }
 0x923   : > { %v2728_v46 = vpop.f32.mrf.mxu1 }
 0x924   : > { %v6331_v23 = vadd.f32 %v6099_v11, %v2728_v46  ;;  %v3329_v46 = vld [vmem:[%s6697_s15 + $0x70] sm:$0xff] }
 0x925   : > { %v5130_v47 = vpop.f32.mrf.mxu1 }
 0x926   : > { %v6316_v32 = vadd.f32 %v5130_v47, %v6099_v11  ;;  %v3330_v47 = vld [vmem:[%s6697_s15 + $0x78] sm:$0xff] }
 0x927   : > { %v2738_v48 = vpop.f32.mrf.mxu1 }
 0x928   : > { %v6321_v20 = vadd.f32 %v6099_v11, %v2738_v48  ;;  %v3090_v48 = vld [vmem:[%s6696_s14] sm:$0xff] }
 0x929   : > { %v5133_v49 = vpop.f32.mrf.mxu1 }
 0x92a   : > { %v6306_v16 = vadd.f32 %v5133_v49, %v6099_v11 }
 0x92b   : > { %v2748_v33 = vpop.f32.mrf.mxu1 }
 0x92c   : > { %v6311_v53 = vadd.f32 %v6099_v11, %v2748_v33 }
 0x92d   : > { %v5136_v18 = vpop.f32.mrf.mxu1 }
 0x92e   : > { %v6298_v10 = vadd.f32 %v5136_v18, %v6099_v11 }
 0x92f   : > { %v2758_v14 = vpop.f32.mrf.mxu1 }
 0x930   : > { %v6301_v15 = vadd.f32 %v6099_v11, %v2758_v14  ;;  %5172 = vmatprep.subr.mxu1 %v6298_v10  ;;  %v3006_v11 = vld [vmem:[%s6693_s11] sm:$0xff] }
 0x931   : > { %5173 = vmatpush3.msra.mxu1 %v6298_v10  ;;  %5212 = vmatprep.subr.mxu0 %v3006_v11 }
 0x932   : > { %5174 = vmatprep.subr.mxu1 %v6301_v15  ;;  %5213 = vmatpush3.msra.mxu0 %v3006_v11 }
 0x933   : > { %5175 = vmatpush3.msra.mxu1 %v6301_v15 }
 0x934   : > { %5176 = vmatprep.subr.mxu1 %v6306_v16 }
 0x935   : > { %5177 = vmatpush3.msra.mxu1 %v6306_v16 }
 0x936   : > { %5178 = vmatprep.subr.mxu1 %v6311_v53 }
 0x937   : > { %5179 = vmatpush3.msra.mxu1 %v6311_v53 }
 0x938   : > { %5180 = vmatprep.subr.mxu1 %v6316_v32 }
 0x939   : > { %5181 = vmatpush3.msra.mxu1 %v6316_v32 }
 0x93a   : > { %5182 = vmatprep.subr.mxu1 %v6321_v20 }
 0x93b   : > { %5183 = vmatpush3.msra.mxu1 %v6321_v20 }
 0x93c   : > { %5184 = vmatprep.subr.mxu1 %v6326_v22 }
 0x93d   : > { %5185 = vmatpush3.msra.mxu1 %v6326_v22 }
 0x93e   : > { %5186 = vmatprep.subr.mxu1 %v6331_v23 }
 0x93f   : > { %5187 = vmatpush3.msra.mxu1 %v6331_v23 }
 0x940   : > { %5188 = vmatprep.subr.mxu1 %v6336_v24 }
 0x941   : > { %5189 = vmatpush3.msra.mxu1 %v6336_v24 }
 0x942   : > { %5190 = vmatprep.subr.mxu1 %v6341_v52 }
 0x943   : > { %5191 = vmatpush3.msra.mxu1 %v6341_v52 }
 0x944   : > { %5192 = vmatprep.subr.mxu1 %v6346_v50 }
 0x945   : > { %5193 = vmatpush3.msra.mxu1 %v6346_v50 }
 0x946   : > { %5194 = vmatprep.subr.mxu1 %v6351_v19 }
 0x947   : > { %5195 = vmatpush3.msra.mxu1 %v6351_v19 }
 0x948   : > { %5196 = vmatprep.subr.mxu1 %v6356_v30 }
 0x949   : > { %5197 = vmatpush3.msra.mxu1 %v6356_v30 }
 0x94a   : > { %5198 = vmatprep.subr.mxu1 %v6361_v26 }
 0x94b   : > { %5199 = vmatpush3.msra.mxu1 %v6361_v26 }
 0x94c   : > { %5200 = vmatprep.subr.mxu1 %v6366_v31 }
 0x94d   : > { %5201 = vmatpush3.msra.mxu1 %v6366_v31 }
 0x94e   : > { %5202 = vmatprep.subr.mxu1 %v6371_v28 }
 0x94f   : > { %5203 = vmatpush3.msra.mxu1 %v6371_v28 }
 0x950   : > { %5205 = vmatmul.mubr.f32.vlgmr.msra.gmra.mxu1 %v2845_v58  ;;  %5207 = vmatprep.subr.mxu1 %v2921_v56  ;;  %v3092_v58 = vld [vmem:[%s6696_s14 + $0x10] sm:$0xff] }
 0x951   : > { %5208 = vmatpush3.msra.mxu1 %v2921_v56  ;;  %5209 = vmatprep.mubr.msk.f32.mxu1 %vm2922_vm2, %v2835_v54  ;;  %v3093_v54 = vld [vmem:[%s6696_s14 + $0x18] sm:$0xff] }
 0x954   : > { %5210 = vmatmul.mubr.msk.f32.vlgmr.msra.gmra.mxu1 %vm2922_vm2, %v5171_v27  ;;  %v3091_v27 = vld [vmem:[%s6696_s14 + $0x8] sm:$0xff] }
 0x955   : > { %5249 = vmatprep.mubr.msk.f32.mxu1 %vm623_vm0, %v3315_v61  ;;  %v3094_v61 = vld [vmem:[%s6696_s14 + $0x20] sm:$0xff] }
 0xa10   : > { %v5206_v2 = vpop.f32.mrf.mxu1 }
 0xa12   : > { %v2912_v1 = vpop.f32.mrf.mxu1 }
 0xa13   : > { %5214 = vmatprep.mubr.msk.f32.mxu0 %vm2922_vm2, %v2912_v1  ;;  %v3095_v1 = vld [vmem:[%s6696_s14 + $0x28] sm:$0xff] }
 0xa14   : > { %v5211_v57 = vpop.f32.mrf.mxu1  ;;  %5215 = vmatmul.mubr.msk.f32.vlgmr.msra.gmra.mxu0 %vm2922_vm2, %v5206_v2 }
 0xa15   : > { %5370 = vtanh.f32 %v5211_v57  ;;  %5221 = vmatprep.mubr.msk.f32.mxu0 %vm623_vm0, %v3090_v48  ;;  %v3105_v48 = vld [vmem:[%s6696_s14 + $0x78] sm:$0xff] }
 0xa16   : > { %v2995_v34 = vpop.f32.mrf.mxu1 }
 0xa17   : > { %5372 = vtanh.f32 %v2995_v34  ;;  %v3096_v34 = vld [vmem:[%s6696_s14 + $0x30] sm:$0xff] }
 0xa22   : > { %v5371_v4 = vpop.eup %5370 }
 0xa23   : > { %5245 = vmatprep.subr.mxu1 %v5371_v4 }
 0xa24   : > { %v5373_v6 = vpop.eup %5372  ;;  %5246 = vmatpush3.msra.mxu1 %v5371_v4 }
 0xa25   : > { %5247 = vmatprep.subr.mxu1 %v5373_v6 }
 0xa26   : > { %5248 = vmatpush3.msra.mxu1 %v5373_v6  ;;  %v3097_v6 = vld [vmem:[%s6696_s14 + $0x38] sm:$0xff] }
 0xa27   : > { %5250 = vmatmul.mubr.msk.f32.vlgmr.msra.gmra.mxu1 %vm623_vm0, %v3316_v7 }
 0xa28   : > { %5252 = vmatprep.mubr.msk.f32.mxu1 %vm623_vm0, %v3317_v8  ;;  %v3098_v8 = vld [vmem:[%s6696_s14 + $0x40] sm:$0xff] }
 0xa2b   : > { %5253 = vmatmul.mubr.msk.f32.gmra.mxu1 %vm623_vm0, %v3318_v55 }
 0xa2c   : > { %5255 = vmatprep.mubr.msk.f32.mxu1 %vm623_vm0, %v3319_v36  ;;  %v3099_v36 = vld [vmem:[%s6696_s14 + $0x48] sm:$0xff] }
 0xa2f   : > { %5256 = vmatmul.mubr.msk.f32.gmra.mxu1 %vm623_vm0, %v3320_v37 }
 0xa30   : > { %5258 = vmatprep.mubr.msk.f32.mxu1 %vm623_vm0, %v3321_v38  ;;  %v3100_v38 = vld [vmem:[%s6696_s14 + $0x50] sm:$0xff] }
 0xa33   : > { %5259 = vmatmul.mubr.msk.f32.gmra.mxu1 %vm623_vm0, %v3322_v39 }
 0xa34   : > { %5261 = vmatprep.mubr.msk.f32.mxu1 %vm623_vm0, %v3323_v40  ;;  %v3101_v40 = vld [vmem:[%s6696_s14 + $0x58] sm:$0xff] }
 0xa37   : > { %5262 = vmatmul.mubr.msk.f32.gmra.mxu1 %vm623_vm0, %v3324_v41 }
 0xa38   : > { %5264 = vmatprep.mubr.msk.f32.mxu1 %vm623_vm0, %v3325_v42  ;;  %v3102_v42 = vld [vmem:[%s6696_s14 + $0x60] sm:$0xff] }
 0xa3b   : > { %5265 = vmatmul.mubr.msk.f32.gmra.mxu1 %vm623_vm0, %v3326_v43 }
 0xa3c   : > { %5267 = vmatprep.mubr.msk.f32.mxu1 %vm623_vm0, %v3327_v44  ;;  %v3103_v44 = vld [vmem:[%s6696_s14 + $0x68] sm:$0xff] }
 0xa3f   : > { %5268 = vmatmul.mubr.msk.f32.gmra.mxu1 %vm623_vm0, %v3328_v45 }
 0xa40   : > { %5270 = vmatprep.mubr.msk.f32.mxu1 %vm623_vm0, %v3329_v46  ;;  %v3104_v46 = vld [vmem:[%s6696_s14 + $0x70] sm:$0xff] }
 0xa43   : > { %5271 = vmatmul.mubr.msk.f32.gmra.mxu1 %vm623_vm0, %v3330_v47 }
 0xad4   : > { %v5216_v49 = vpop.f32.mrf.mxu0 }
 0xad5   : > { %5374 = vtanh.f32 %v5216_v49 }
 0xad6   : > { %v3079_v33 = vpop.f32.mrf.mxu0 }
 0xad7   : > { %5376 = vtanh.f32 %v3079_v33 }
 0xae2   : > { %v5375_v18 = vpop.eup %5374 }
 0xae3   : > { %5217 = vmatprep.subr.mxu0 %v5375_v18 }
 0xae4   : > { %v5377_v14 = vpop.eup %5376  ;;  %5218 = vmatpush3.msra.mxu0 %v5375_v18 }
 0xae5   : > { %5219 = vmatprep.subr.mxu0 %v5377_v14 }
 0xae6   : > { %5220 = vmatpush3.msra.mxu0 %v5377_v14 }
 0xae7   : > { %5222 = vmatmul.mubr.msk.f32.vlgmr.msra.gmra.mxu0 %vm623_vm0, %v3091_v27  ;;  %v6465_v56 = vpop.f32.mrf.mxu1 }
 0xae8   : > { %5224 = vmatprep.mubr.msk.f32.mxu0 %vm623_vm0, %v3092_v58 }
 0xae9   : > { %v6471_v11 = vpop.f32.mrf.mxu1 }
 0xaeb   : > { %5225 = vmatmul.mubr.msk.f32.gmra.mxu0 %vm623_vm0, %v3093_v54  ;;  %v6477_v2 = vpop.f32.mrf.mxu1 }
 0xaec   : > { %5227 = vmatprep.mubr.msk.f32.mxu0 %vm623_vm0, %v3094_v61 }
 0xaed   : > { %v6483_v57 = vpop.f32.mrf.mxu1 }
 0xaef   : > { %5228 = vmatmul.mubr.msk.f32.gmra.mxu0 %vm623_vm0, %v3095_v1  ;;  %v5257_v4 = vpop.f32.mrf.mxu1 }
 0xaf0   : > { %5230 = vmatprep.mubr.msk.f32.mxu0 %vm623_vm0, %v3096_v34 }
 0xaf1   : > { %v3465_v7 = vpop.f32.mrf.mxu1 }
 0xaf3   : > { %5231 = vmatmul.mubr.msk.f32.gmra.mxu0 %vm623_vm0, %v3097_v6  ;;  %v5260_v55 = vpop.f32.mrf.mxu1 }
 0xaf4   : > { %5233 = vmatprep.mubr.msk.f32.mxu0 %vm623_vm0, %v3098_v8 }
 0xaf5   : > { %v3475_v37 = vpop.f32.mrf.mxu1 }
 0xaf7   : > { %5234 = vmatmul.mubr.msk.f32.gmra.mxu0 %vm623_vm0, %v3099_v36  ;;  %v5263_v39 = vpop.f32.mrf.mxu1 }
 0xaf8   : > { %5236 = vmatprep.mubr.msk.f32.mxu0 %vm623_vm0, %v3100_v38 }
 0xaf9   : > { %v3485_v41 = vpop.f32.mrf.mxu1 }
 0xafb   : > { %5237 = vmatmul.mubr.msk.f32.gmra.mxu0 %vm623_vm0, %v3101_v40  ;;  %v5266_v43 = vpop.f32.mrf.mxu1 }
 0xafc   : > { %5239 = vmatprep.mubr.msk.f32.mxu0 %vm623_vm0, %v3102_v42 }
 0xafd   : > { %v3495_v45 = vpop.f32.mrf.mxu1 }
 0xaff   : > { %5240 = vmatmul.mubr.msk.f32.gmra.mxu0 %vm623_vm0, %v3103_v44  ;;  %v5269_v47 = vpop.f32.mrf.mxu1 }
 0xb00   : > { %5242 = vmatprep.mubr.msk.f32.mxu0 %vm623_vm0, %v3104_v46  ;;  %v3537_v58 = vsub.f32 %v6306_v16, %v5269_v47  ;;  %v3533_v16 = vsub.f32 %v6326_v22, %v5263_v39  ;;  %v3529_v22 = vsub.f32 %v6346_v50, %v5257_v4  ;;  %v3525_v50 = vsub.f32 %v6366_v31, %v6465_v56 }
 0xb01   : > { %v3505_v49 = vpop.f32.mrf.mxu1 }
 0xb02   : > { %v3536_v54 = vsub.f32 %v6311_v53, %v3505_v49  ;;  %v3532_v53 = vsub.f32 %v6331_v23, %v3485_v41  ;;  %v3528_v23 = vsub.f32 %v6351_v19, %v3465_v7  ;;  %v3524_v19 = vsub.f32 %v6371_v28, %v6471_v11 }
 0xb03   : > { %5243 = vmatmul.mubr.msk.f32.gmra.mxu0 %vm623_vm0, %v3105_v48  ;;  %v5272_v33 = vpop.f32.mrf.mxu1 }
 0xb04   : > { %v3539_v18 = vsub.f32 %v6298_v10, %v5272_v33  ;;  %v3535_v10 = vsub.f32 %v6316_v32, %v5266_v43  ;;  %v3531_v32 = vsub.f32 %v6336_v24, %v5260_v55  ;;  %v3527_v24 = vsub.f32 %v6356_v30, %v6477_v2 }
 0xb05   : > { %v3515_v14 = vpop.f32.mrf.mxu1 }
 0xb06   : > { %v3538_v27 = vsub.f32 %v6301_v15, %v3515_v14  ;;  %5273 = vmatprep.subr.msk.mxu0 %vm2922_vm2, %v3539_v18  ;;  %v3534_v15 = vsub.f32 %v6321_v20, %v3495_v45  ;;  %v3530_v20 = vsub.f32 %v6341_v52, %v3475_v37  ;;  %v3526_v52 = vsub.f32 %v6361_v26, %v6483_v57 }
 0xb07   : > { %5274 = vmatpush3.xpose.msk.msra.mxu0 %vm2922_vm2, %v3539_v18 }
 0xb08   : > { %5275 = vmatprep.subr.msk.mxu0 %vm2922_vm2, %v3538_v27 }
 0xb0b   : > { %5276 = vmatpush3.xpose.msk.msra.mxu0 %vm2922_vm2, %v3538_v27 }
 0xb0c   : > { %5277 = vmatprep.subr.msk.mxu0 %vm2922_vm2, %v3537_v58 }
 0xb0f   : > { %5278 = vmatpush3.xpose.msk.msra.mxu0 %vm2922_vm2, %v3537_v58 }
 0xb10   : > { %5279 = vmatprep.subr.msk.mxu0 %vm2922_vm2, %v3536_v54 }
 0xb13   : > { %5280 = vmatpush3.xpose.msk.msra.mxu0 %vm2922_vm2, %v3536_v54 }
 0xb14   : > { %5281 = vmatprep.subr.msk.mxu0 %vm2922_vm2, %v3535_v10 }
 0xb17   : > { %5282 = vmatpush3.xpose.msk.msra.mxu0 %vm2922_vm2, %v3535_v10 }
 0xb18   : > { %5283 = vmatprep.subr.msk.mxu0 %vm2922_vm2, %v3534_v15 }
 0xb1b   : > { %5284 = vmatpush3.xpose.msk.msra.mxu0 %vm2922_vm2, %v3534_v15 }
 0xb1c   : > { %5285 = vmatprep.subr.msk.mxu0 %vm2922_vm2, %v3533_v16 }
 0xb1f   : > { %5286 = vmatpush3.xpose.msk.msra.mxu0 %vm2922_vm2, %v3533_v16 }
 0xb20   : > { %5287 = vmatprep.subr.msk.mxu0 %vm2922_vm2, %v3532_v53 }
 0xb23   : > { %5288 = vmatpush3.xpose.msk.msra.mxu0 %vm2922_vm2, %v3532_v53 }
 0xb24   : > { %5289 = vmatprep.subr.msk.mxu0 %vm2922_vm2, %v3531_v32 }
 0xb27   : > { %5290 = vmatpush3.xpose.msk.msra.mxu0 %vm2922_vm2, %v3531_v32 }
 0xb28   : > { %5291 = vmatprep.subr.msk.mxu0 %vm2922_vm2, %v3530_v20 }
 0xb2b   : > { %5292 = vmatpush3.xpose.msk.msra.mxu0 %vm2922_vm2, %v3530_v20 }
 0xb2c   : > { %5293 = vmatprep.subr.msk.mxu0 %vm2922_vm2, %v3529_v22 }
 0xb2f   : > { %5294 = vmatpush3.xpose.msk.msra.mxu0 %vm2922_vm2, %v3529_v22 }
 0xb30   : > { %5295 = vmatprep.subr.msk.mxu0 %vm2922_vm2, %v3528_v23 }
 0xb33   : > { %5296 = vmatpush3.xpose.msk.msra.mxu0 %vm2922_vm2, %v3528_v23 }
 0xb34   : > { %5297 = vmatprep.subr.msk.mxu0 %vm2922_vm2, %v3527_v24 }
 0xb37   : > { %5298 = vmatpush3.xpose.msk.msra.mxu0 %vm2922_vm2, %v3527_v24 }
 0xb38   : > { %5299 = vmatprep.subr.msk.mxu0 %vm2922_vm2, %v3526_v52 }
 0xb3b   : > { %5300 = vmatpush3.xpose.msk.msra.mxu0 %vm2922_vm2, %v3526_v52 }
 0xb3c   : > { %5301 = vmatprep.subr.msk.mxu0 %vm2922_vm2, %v3525_v50 }
 0xb3f   : > { %5302 = vmatpush3.xpose.msk.msra.mxu0 %vm2922_vm2, %v3525_v50 }
 0xb40   : > { %5303 = vmatprep.subr.msk.mxu0 %vm2922_vm2, %v3524_v19 }
 0xb43   : > { %5304 = vmatpush3.xpose.msk.msra.mxu0 %vm2922_vm2, %v3524_v19 }
 0xba7   : > { %v5223_v30 = vpop.f32.mrf.mxu0 }
 0xba8   : > { %v3300_v2 = vsub.f32 %v6259_v25, %v5223_v30 }
 0xba9   : > { %v3220_v26 = vpop.f32.mrf.mxu0 }
 0xbaa   : > { %v3299_v61 = vsub.f32 %v6266_v51, %v3220_v26 }
 0xbab   : > { %v5226_v31 = vpop.f32.mrf.mxu0 }
 0xbac   : > { %5305 = vmatprep.mubr.msk.f32.mxu0 %vm2922_vm2, %v3299_v61  ;;  %v3302_v11 = vsub.f32 %v6243_v21, %v5226_v31 }
 0xbad   : > { %v3230_v56 = vpop.f32.mrf.mxu0  ;;  %5306 = vmatmul.mubr.msk.f32.vlgmr.msra.gmra.mxu0 %vm2922_vm2, %v3300_v2 }
 0xbae   : > { %v3301_v28 = vsub.f32 %v6252_v0, %v3230_v56 }
 0xbaf   : > { %v5229_v1 = vpop.f32.mrf.mxu0 }
 0xbb0   : > { %5308 = vmatprep.mubr.msk.f32.mxu0 %vm2922_vm2, %v3301_v28  ;;  %v3304_v25 = vsub.f32 %v6227_v12, %v5229_v1 }
 0xbb1   : > { %v3240_v57 = vpop.f32.mrf.mxu0  ;;  %5309 = vmatmul.mubr.msk.f32.gmra.mxu0 %vm2922_vm2, %v3302_v11 }
 0xbb2   : > { %v3303_v51 = vsub.f32 %v6236_v35, %v3240_v57 }
 0xbb3   : > { %v5232_v34 = vpop.f32.mrf.mxu0 }
 0xbb4   : > { %5311 = vmatprep.mubr.msk.f32.mxu0 %vm2922_vm2, %v3303_v51  ;;  %v3306_v21 = vsub.f32 %v6211_v5, %v5232_v34 }
 0xbb5   : > { %v3250_v4 = vpop.f32.mrf.mxu0  ;;  %5312 = vmatmul.mubr.msk.f32.gmra.mxu0 %vm2922_vm2, %v3304_v25 }
 0xbb6   : > { %v3305_v0 = vsub.f32 %v6220_v9, %v3250_v4 }
 0xbb7   : > { %v5235_v6 = vpop.f32.mrf.mxu0 }
 0xbb8   : > { %5314 = vmatprep.mubr.msk.f32.mxu0 %vm2922_vm2, %v3305_v0  ;;  %v3308_v12 = vsub.f32 %v6195_v59, %v5235_v6 }
 0xbb9   : > { %v3260_v7 = vpop.f32.mrf.mxu0  ;;  %5315 = vmatmul.mubr.msk.f32.gmra.mxu0 %vm2922_vm2, %v3306_v21 }
 0xbba   : > { %v3307_v35 = vsub.f32 %v6204_v3, %v3260_v7 }
 0xbbb   : > { %v5238_v8 = vpop.f32.mrf.mxu0 }
 0xbbc   : > { %5317 = vmatprep.mubr.msk.f32.mxu0 %vm2922_vm2, %v3307_v35  ;;  %v3310_v5 = vsub.f32 %v6179_v63, %v5238_v8 }
 0xbbd   : > { %v3270_v55 = vpop.f32.mrf.mxu0  ;;  %5318 = vmatmul.mubr.msk.f32.gmra.mxu0 %vm2922_vm2, %v3308_v12 }
 0xbbe   : > { %v3309_v9 = vsub.f32 %v6188_v29, %v3270_v55 }
 0xbbf   : > { %v5241_v36 = vpop.f32.mrf.mxu0 }
 0xbc0   : > { %5320 = vmatprep.mubr.msk.f32.mxu0 %vm2922_vm2, %v3309_v9  ;;  %v3312_v59 = vsub.f32 %v6163_v62, %v5241_v36 }
 0xbc1   : > { %v3280_v37 = vpop.f32.mrf.mxu0  ;;  %5321 = vmatmul.mubr.msk.f32.gmra.mxu0 %vm2922_vm2, %v3310_v5 }
 0xbc2   : > { %v3311_v3 = vsub.f32 %v6172_v60, %v3280_v37 }
 0xbc3   : > { %v5244_v38 = vpop.f32.mrf.mxu0 }
 0xbc4   : > { %5323 = vmatprep.mubr.msk.f32.mxu0 %vm2922_vm2, %v3311_v3  ;;  %v3314_v63 = vsub.f32 %v6103_v13, %v5244_v38 }
 0xbc5   : > { %v3290_v39 = vpop.f32.mrf.mxu0  ;;  %5324 = vmatmul.mubr.msk.f32.gmra.mxu0 %vm2922_vm2, %v3312_v59 }
 0xbc6   : > { %v3313_v29 = vsub.f32 %v6157_v17, %v3290_v39 }
 0xbc8   : > { %5326 = vmatprep.mubr.msk.f32.mxu0 %vm2922_vm2, %v3313_v29 }
 0xbc9   : > { %5327 = vmatmul.mubr.msk.f32.gmra.mxu0 %vm2922_vm2, %v3314_v63 }
 0xc6d   : > { %v5307_v40 = vpop.f32.mrf.mxu0 }
 0xc6e   : > { %v4186_v41 = vmul.f32 -1.442695, %v5307_v40 }
 0xc6f   : > { %v3702_v42 = vpop.f32.mrf.mxu0 }
 0xc70   : > { %5378 = vpow2.f32 %v4186_v41  ;;  %v4185_v60 = vmul.f32 -1.442695, %v3702_v42 }
 0xc71   : > { %v5310_v62 = vpop.f32.mrf.mxu0 }
 0xc72   : > { %5380 = vpow2.f32 %v4185_v60  ;;  %v4188_v43 = vmul.f32 -1.442695, %v5310_v62 }
 0xc73   : > { %v3712_v44 = vpop.f32.mrf.mxu0 }
 0xc74   : > { %5382 = vpow2.f32 %v4188_v43  ;;  %v4187_v45 = vmul.f32 -1.442695, %v3712_v44 }
 0xc75   : > { %v5313_v46 = vpop.f32.mrf.mxu0 }
 0xc76   : > { %5384 = vpow2.f32 %v4187_v45  ;;  %v4190_v17 = vmul.f32 -1.442695, %v5313_v46 }
 0xc77   : > { %v3722_v47 = vpop.f32.mrf.mxu0 }
 0xc78   : > { %5386 = vpow2.f32 %v4190_v17  ;;  %v4189_v13 = vmul.f32 -1.442695, %v3722_v47 }
 0xc79   : > { %v5316_v48 = vpop.f32.mrf.mxu0 }
 0xc7a   : > { %5388 = vpow2.f32 %v4189_v13  ;;  %v4192_v49 = vmul.f32 -1.442695, %v5316_v48 }
 0xc7b   : > { %v3732_v33 = vpop.f32.mrf.mxu0 }
 0xc7c   : > { %5390 = vpow2.f32 %v4192_v49  ;;  %v4191_v18 = vmul.f32 -1.442695, %v3732_v33 }
 0xc7d   : > { %v5379_v14 = vpop.eup %5378  ;;  %v5319_v27 = vpop.f32.mrf.mxu0 }
 0xc7e   : > { %v3830_v58 = vadd.f32 1.0, %v5379_v14  ;;  %5392 = vpow2.f32 %v4191_v18  ;;  %v4194_v54 = vmul.f32 -1.442695, %v5319_v27 }
 0xc7f   : > { %v5381_v10 = vpop.eup %5380  ;;  %v3742_v15 = vpop.f32.mrf.mxu0 }
 0xc80   : > { %5394 = vrcp.f32 %v3830_v58  ;;  %v3829_v16 = vadd.f32 1.0, %v5381_v10  ;;  %v4193_v53 = vmul.f32 -1.442695, %v3742_v15 }
 0xc81   : > { %v5383_v32 = vpop.eup %5382  ;;  %5396 = vpow2.f32 %v4194_v54  ;;  %v5322_v20 = vpop.f32.mrf.mxu0 }
 0xc82   : > { %5398 = vrcp.f32 %v3829_v16  ;;  %v3832_v22 = vadd.f32 1.0, %v5383_v32  ;;  %v4196_v23 = vmul.f32 -1.442695, %v5322_v20 }
 0xc83   : > { %v5385_v24 = vpop.eup %5384  ;;  %5400 = vpow2.f32 %v4193_v53  ;;  %v3752_v52 = vpop.f32.mrf.mxu0 }
 0xc84   : > { %5402 = vrcp.f32 %v3832_v22  ;;  %v3831_v50 = vadd.f32 1.0, %v5385_v24  ;;  %v4195_v19 = vmul.f32 -1.442695, %v3752_v52 }
 0xc85   : > { %v5387_v30 = vpop.eup %5386  ;;  %5404 = vpow2.f32 %v4196_v23  ;;  %v5325_v26 = vpop.f32.mrf.mxu0 }
 0xc86   : > { %5406 = vrcp.f32 %v3831_v50  ;;  %v3834_v61 = vadd.f32 1.0, %v5387_v30  ;;  %v4198_v2 = vmul.f32 -1.442695, %v5325_v26 }
 0xc87   : > { %v5389_v31 = vpop.eup %5388  ;;  %5408 = vpow2.f32 %v4195_v19  ;;  %v3762_v56 = vpop.f32.mrf.mxu0 }
 0xc88   : > { %5410 = vrcp.f32 %v3834_v61  ;;  %v3833_v28 = vadd.f32 1.0, %v5389_v31  ;;  %v4197_v11 = vmul.f32 -1.442695, %v3762_v56 }
 0xc89   : > { %v5391_v1 = vpop.eup %5390  ;;  %5412 = vpow2.f32 %v4198_v2  ;;  %v5328_v57 = vpop.f32.mrf.mxu0 }
 0xc8a   : > { %5414 = vrcp.f32 %v3833_v28  ;;  %v3836_v51 = vadd.f32 1.0, %v5391_v1  ;;  %v4200_v25 = vmul.f32 -1.442695, %v5328_v57 }
 0xc8b   : > { %v5393_v34 = vpop.eup %5392  ;;  %5416 = vpow2.f32 %v4197_v11  ;;  %v3772_v4 = vpop.f32.mrf.mxu0 }
 0xc8c   : > { %5418 = vrcp.f32 %v3836_v51  ;;  %v3835_v0 = vadd.f32 1.0, %v5393_v34  ;;  %v4199_v21 = vmul.f32 -1.442695, %v3772_v4 }
 0xc8d   : > { %v5395_v6 = vpop.eup %5394  ;;  %5420 = vpow2.f32 %v4200_v25 }
 0xc8e   : > { %v5397_v7 = vpop.eup %5396  ;;  %3878 = vst [vmem:[%s6613_s19 + $0x8] sm:$0xff] %v5395_v6  ;;  %5422 = vrcp.f32 %v3835_v0 }
 0xc8f   : > { %v5399_v35 = vpop.eup %5398  ;;  %v3838_v12 = vadd.f32 1.0, %v5397_v7  ;;  %5424 = vpow2.f32 %v4199_v21 }
 0xc90   : > { %v5401_v8 = vpop.eup %5400  ;;  %3877 = vst [vmem:[%s6613_s19] sm:$0xff] %v5399_v35 }
 0xc91   : > { %v5403_v55 = vpop.eup %5402  ;;  %5426 = vrcp.f32 %v3838_v12  ;;  %v3837_v9 = vadd.f32 1.0, %v5401_v8 }
 0xc92   : > { %v5405_v5 = vpop.eup %5404  ;;  %3880 = vst [vmem:[%s6613_s19 + $0x18] sm:$0xff] %v5403_v55 }
 0xc93   : > { %v5407_v36 = vpop.eup %5406  ;;  %5428 = vrcp.f32 %v3837_v9  ;;  %v3840_v37 = vadd.f32 1.0, %v5405_v5 }
 0xc94   : > { %v5409_v3 = vpop.eup %5408  ;;  %3879 = vst [vmem:[%s6613_s19 + $0x10] sm:$0xff] %v5407_v36 }
 0xc95   : > { %v5411_v59 = vpop.eup %5410  ;;  %5430 = vrcp.f32 %v3840_v37  ;;  %v3839_v38 = vadd.f32 1.0, %v5409_v3 }
 0xc96   : > { %v5413_v39 = vpop.eup %5412  ;;  %3882 = vst [vmem:[%s6613_s19 + $0x28] sm:$0xff] %v5411_v59 }
 0xc97   : > { %v5415_v29 = vpop.eup %5414  ;;  %5432 = vrcp.f32 %v3839_v38  ;;  %v3842_v63 = vadd.f32 1.0, %v5413_v39 }
 0xc98   : > { %v5417_v40 = vpop.eup %5416  ;;  %3881 = vst [vmem:[%s6613_s19 + $0x20] sm:$0xff] %v5415_v29 }
 0xc99   : > { %v5419_v41 = vpop.eup %5418  ;;  %5434 = vrcp.f32 %v3842_v63  ;;  %v3841_v42 = vadd.f32 1.0, %v5417_v40 }
 0xc9a   : > { %v5421_v60 = vpop.eup %5420  ;;  %3884 = vst [vmem:[%s6613_s19 + $0x38] sm:$0xff] %v5419_v41 }
 0xc9b   : > { %v5423_v62 = vpop.eup %5422  ;;  %5436 = vrcp.f32 %v3841_v42  ;;  %v3844_v43 = vadd.f32 1.0, %v5421_v60 }
 0xc9c   : > { %v5425_v44 = vpop.eup %5424  ;;  %3883 = vst [vmem:[%s6613_s19 + $0x30] sm:$0xff] %v5423_v62 }
 0xc9d   : > { %5438 = vrcp.f32 %v3844_v43  ;;  %v3843_v45 = vadd.f32 1.0, %v5425_v44 }
 0xc9e   : > { %v5427_v46 = vpop.eup %5426 }
 0xc9f   : > { %3886 = vst [vmem:[%s6613_s19 + $0x48] sm:$0xff] %v5427_v46  ;;  %5440 = vrcp.f32 %v3843_v45 }
 0xca0   : > { %v5429_v17 = vpop.eup %5428 }
 0xca1   : > { %3885 = vst [vmem:[%s6613_s19 + $0x40] sm:$0xff] %v5429_v17 }
 0xca2   : > { %v5431_v47 = vpop.eup %5430 }
 0xca3   : > { %3888 = vst [vmem:[%s6613_s19 + $0x58] sm:$0xff] %v5431_v47 }
 0xca4   : > { %v5433_v13 = vpop.eup %5432 }
 0xca5   : > { %3887 = vst [vmem:[%s6613_s19 + $0x50] sm:$0xff] %v5433_v13 }
 0xca6   : > { %v5435_v48 = vpop.eup %5434 }
 0xca7   : > { %3890 = vst [vmem:[%s6613_s19 + $0x68] sm:$0xff] %v5435_v48 }
 0xca8   : > { %v5437_v49 = vpop.eup %5436 }
 0xca9   : > { %3889 = vst [vmem:[%s6613_s19 + $0x60] sm:$0xff] %v5437_v49 }
 0xcaa   : > { %v5439_v33 = vpop.eup %5438 }
 0xcab   : > { %3892 = vst [vmem:[%s6613_s19 + $0x78] sm:$0xff] %v5439_v33 }
 0xcac   : > { %v5441_v18 = vpop.eup %5440 }
 0xcad   : > { %3891 = vst [vmem:[%s6613_s19 + $0x70] sm:$0xff] %v5441_v18 }
 0xcae   : > { %5455 = shalt.err (!%p5452_p3)
}
 0xcaf   : > { %s5456_s2 = scalar_lea.hbm %s6634_s29, 2048  ;;  %s5460_s3 = scalar_lea.hbm %s6698_s16, 4096 }
 0xcb0   : > { %p5457_p4 = scmp.ne.s32.totalorder %s6634_s29, %s5456_s2  ;;  %p5461_p9 = scmp.lt.s32.totalorder %s6634_s29, %s6698_s16 }
 0xcb1   : > { %p5462_p10 = scmp.lt.s32.totalorder %s5460_s3, %s5456_s2 }
 0xcb2   : > { %p5458_p7 = pnand %p5457_p4, %p5630_p5 }
 0xcb3   : > { %p5463_p11 = por %p5462_p10, %p5461_p9 }
 0xcb4   : > { %p5459_p8 = pneg %p5458_p7 }
 0xcb6   : > { %p5464_p12 = pnand %p5463_p11, %p5459_p8 }
 0xcb8   : > { %5467 = shalt.err (!%p5464_p12)
}
 0xcb9   : > { %s5505_s25 = smov 128   ;;  %s5506_s28 = smov 8  }
 0xcba   : > { %5329 = dma.vmem_to_hbm [thread:$0]  (%p5630_p5), %s6636_s26, 2048, %s6634_s29, %s6642_s1, %s5505_s25, %s5505_s25, %s5506_s28  }
 0xcbb PF: > { %p5335_p13 = scmp.ge.s32.totalorder %s5502_s24, 2  ;;  %s3922_s20 = sand.u32 1, %s5490_s21  }
 0xcbc   : > { %s3923_s4 = scalar_lea.sflag [#allocation3], %s3922_s20 }
 0xcbd   : > { %p5332_p0 = pnand %p5335_p13, %p5634_p6 }
 0xcbf   : > { %p5333_p1 = pneg %p5332_p0 }
 0xcc1   : > { %5485 = dma.done.wait (%p5333_p1), %s3923_s4, 2048  }
 0xcc2   : > { %5487 = vsyncadd (%p5333_p1), %s3923_s4, 4294965248  ;;  %p26_p2 = scmp.ge.s32.totalorder %s5617_s27, 4   ;;  %s6713_s21 = smov %s5494_s22 }
 0xcc3   : > { %s6714_s22 = smov %s5498_s23  ;;  %s6715_s23 = smov %s5628_s30 }
 0xcc4   : > { %s6716_s24 = smov %s5617_s27  ;;  %28 = sbr.rel (!%p26_p2) target bundleno = 10 (0xa), region = 128 }
 0xcc9   :  { %3928 = vsyncpa [#allocation3], 1 }
 0xcca   :  { %3930 = vsyncpa [#allocation3 + $0x1], 1 }

</bundles_post_ra>
